<compile_context>
chip_gen: v7x
topology: tpu7x:2x2x1
jax: 0.10.0
libtpu: 0.0.40
codegen_flags: <defaults>
</compile_context>

<pallas_src>
import functools

import jax
import jax.numpy as jnp
import numpy as np
from jax.experimental import pallas as pl
from jax.experimental.pallas import tpu as pltpu


def _relative_position_index(ws):
    """Matches the relative_position_index buffer built in __init__."""
    coords = np.stack(np.meshgrid(np.arange(ws), np.arange(ws), indexing="ij"))
    coords_flat = coords.reshape(2, -1)                               # (2, wa)
    rel = coords_flat[:, :, None] - coords_flat[:, None, :]           # (2, wa, wa)
    rel = rel.transpose(1, 2, 0).astype(np.int64)                     # (wa, wa, 2)
    rel[:, :, 0] += ws - 1
    rel[:, :, 1] += ws - 1
    rel[:, :, 0] *= 2 * ws - 1
    return jnp.asarray(rel.sum(-1), dtype=jnp.int32)                  # (wa, wa)


# ---------------------------------------------------------------------------
# Fused kernel: QKV projection + per-window MHA + output projection
# ---------------------------------------------------------------------------
def _fused_wmsa_kernel(x_ref, wqkv_ref, bqkv_ref, bias_ref, mask_ref,
                       wproj_ref, bproj_ref, o_ref, qkv_ref, acc_ref, *, scale):
    ws, wbw, _, C = x_ref.shape
    H = bias_ref.shape[0]
    wa = ws * ws
    f32 = jnp.float32

    # --- fused QKV projection for every token of this block of windows -----
    tok = x_ref[...].reshape(ws * wbw * ws, C).astype(f32)
    for t in range(3):                                     # q, k, v (static)
        y = jnp.dot(tok, wqkv_ref[t].astype(f32), preferred_element_type=f32)
        y = y + bqkv_ref[t].astype(f32)
        qkv_ref[t] = y.reshape(ws, wbw, ws, C)

    # --- per-window multi-head attention + fused output projection ---------
    for j in range(wbw):                                   # windows (static)
        q = qkv_ref[0, :, j, :, :].reshape(wa, C) * scale
        k = qkv_ref[1, :, j, :, :].reshape(wa, C)
        v = qkv_ref[2, :, j, :, :].reshape(wa, C)
        acc_ref[...] = jnp.zeros_like(acc_ref)
        for h in range(H):                                 # heads (static)
            m = mask_ref[h]                                # (1, C) 0/1 head mask
            # masked full-C contraction == per-head q_h @ k_h^T, but every
            # operand stays on the well-tiled C-wide minor dim.
            s = jax.lax.dot_general(q * m, k, (((1,), (1,)), ((), ())),
                                    preferred_element_type=f32)      # (wa, wa)
            s = s + bias_ref[h]
            s = s - jnp.max(s, axis=-1, keepdims=True)
            p = jnp.exp(s)
            denom = jnp.sum(p, axis=-1, keepdims=True)
            p = p * pl.reciprocal(denom, approx=True)      # EUP, not VALU divide
            acc_ref[...] += jnp.dot(p, v * m, preferred_element_type=f32)
        out = jnp.dot(acc_ref[...], wproj_ref[...].astype(f32),
                      preferred_element_type=f32) + bproj_ref[...].astype(f32)
        o_ref[j] = out.astype(o_ref.dtype)


def _pick_windows_per_step(rows, n_win_w, ws, C, H, wa):
    """How many window-columns each grid step processes.

    Prefer the largest batch that (a) keeps >= 8 grid steps when possible
    (software pipelining + megacore sharding; never collapse the grid) and
    (b) keeps double-buffered blocks + resident weights well inside v7x's
    64 MiB physical / 32 MiB scoped VMEM.
    """
    n_win = rows * n_win_w
    target_steps = min(8, n_win)
    lane = 128
    c_pad = -(-C // lane) * lane
    wa_pad = -(-wa // lane) * lane
    resident = (3 * C * c_pad + 3 * c_pad + H * wa * wa_pad
                + C * c_pad + c_pad + H * c_pad) * 4
    for cand in range(n_win_w, 0, -1):
        if n_win_w % cand:
            continue
        steps = rows * (n_win_w // cand)
        x_blk = ws * cand * ws * c_pad * 4
        o_blk = cand * wa * c_pad * 4
        scratch = (3 * ws * cand * ws * c_pad + wa * c_pad) * 4
        vmem = 2 * (x_blk + o_blk) + 2 * resident + scratch
        if steps >= target_steps and vmem <= 24 * 2 ** 20:
            return cand
    return 1


def window_attention(x, params, *, window_size, num_heads):
    """x: (B, nH, nW, C).  Returns (num_windows*B, window_area, C)."""
    B, nH, nW, C = x.shape
    ws = int(window_size)
    wa = ws * ws
    H = int(num_heads)
    hd = C // H
    assert nH % ws == 0 and nW % ws == 0 and C % H == 0
    scale = float(hd) ** -0.5

    n_win_h, n_win_w = nH // ws, nW // ws
    rows = B * n_win_h
    n_win = rows * n_win_w

    # ---- one-time parameter prep (tiny, outside the kernel) ----------------
    wqkv3 = jnp.transpose(params["w_qkv"].reshape(C, 3, C), (1, 0, 2))   # (3,C,C)
    bqkv3 = params["b_qkv"].reshape(3, 1, C)
    w_proj = params["w_proj"]                                            # (C, C)
    b_proj = params["b_proj"].reshape(1, C)
    idx = _relative_position_index(ws)                                   # (wa, wa)
    bias = jnp.take(params["rel_pos_bias_table"], idx.reshape(-1), axis=0)
    bias = bias.reshape(wa, wa, H).transpose(2, 0, 1).astype(jnp.float32)  # (H,wa,wa)
    head_mask = jnp.asarray(
        np.kron(np.eye(H, dtype=np.float32), np.ones((1, hd), np.float32))
    ).reshape(H, 1, C)

    # x viewed so every window is one contiguous rectangular tile.
    x_view = x.reshape(B * nH, n_win_w, ws, C)

    wbw = _pick_windows_per_step(rows, n_win_w, ws, C, H, wa)
    nwj = n_win_w // wbw

    flops = n_win * (8 * wa * C * C + 4 * H * wa * wa * C)
    cost = pl.CostEstimate(
        flops=int(flops),
        transcendentals=int(n_win * H * wa * (wa + 1)),
        bytes_accessed=int((2 * x.size + 4 * C * C + 4 * C + H * wa * wa) * 4),
    )

    kern = functools.partial(_fused_wmsa_kernel, scale=scale)
    out = pl.pallas_call(
        kern,
        out_shape=jax.ShapeDtypeStruct((n_win, wa, C), x.dtype),
        grid_spec=pltpu.PrefetchScalarGridSpec(
            num_scalar_prefetch=0,
            grid=(rows, nwj),
            in_specs=[
                pl.BlockSpec((ws, wbw, ws, C), lambda i, j: (i, j, 0, 0)),
                pl.BlockSpec((3, C, C), lambda i, j: (0, 0, 0)),
                pl.BlockSpec((3, 1, C), lambda i, j: (0, 0, 0)),
                pl.BlockSpec((H, wa, wa), lambda i, j: (0, 0, 0)),
                pl.BlockSpec((H, 1, C), lambda i, j: (0, 0, 0)),
                pl.BlockSpec((C, C), lambda i, j: (0, 0)),
                pl.BlockSpec((1, C), lambda i, j: (0, 0)),
            ],
            out_specs=pl.BlockSpec((wbw, wa, C),
                                   lambda i, j: (i * nwj + j, 0, 0)),
            scratch_shapes=[
                pltpu.VMEM((3, ws, wbw, ws, C), jnp.float32),   # qkv activations
                pltpu.VMEM((wa, C), jnp.float32),               # attn@v accumulator
            ],
        ),
        compiler_params=pltpu.CompilerParams(
            dimension_semantics=("parallel", "parallel"),
            vmem_limit_bytes=32 * 1024 * 1024,
        ),
        cost_estimate=cost,
    )(x_view, wqkv3, bqkv3, bias, head_mask, w_proj, b_proj)
    return out


# ---------------------------------------------------------------------------
# Plain-JAX reference (mirrors the PyTorch forward for the base W-MSA path)
# ---------------------------------------------------------------------------
def reference_window_attention(x, params, *, window_size, num_heads):
    B, nH, nW, C = x.shape
    ws = window_size
    wa = ws * ws
    H = num_heads
    hd = C // H
    scale = hd ** (-0.5)
    with jax.default_matmul_precision("highest"):
        qkv = x.reshape(-1, C) @ params["w_qkv"] + params["b_qkv"]
        qkv = qkv.reshape(B, nH, nW, 3, C)
        q, k, v = qkv[..., 0, :], qkv[..., 1, :], qkv[..., 2, :]

        def part(t):
            t = t.reshape(B, nH // ws, ws, nW // ws, ws, C)
            t = t.transpose(0, 1, 3, 2, 4, 5).reshape(-1, wa, C)
            return t.reshape(-1, wa, H, hd).transpose(0, 2, 1, 3)

        qw, kw, vw = part(q), part(k), part(v)
        idx = _relative_position_index(ws)
        bias = jnp.take(params["rel_pos_bias_table"], idx.reshape(-1), axis=0)
        bias = bias.reshape(wa, wa, H).transpose(2, 0, 1)
        attn = jnp.einsum("whqd,whkd->whqk", qw * scale, kw) + bias[None]
        attn = jax.nn.softmax(attn, axis=-1)
        out = jnp.einsum("whqk,whkd->whqd", attn, vw)
        out = out.transpose(0, 2, 1, 3).reshape(-1, wa, C)
        out = out @ params["w_proj"] + params["b_proj"]
    return out


if __name__ == "__main__":
    # Small shapes consistent with the module: B=2, 16x16 tokens, C=32,
    # window_size=8, num_heads=4 (expand_size=0, pool_method='none').
    B, nH, nW, C = 2, 16, 16, 32
    ws, H = 8, 4

    key = jax.random.PRNGKey(0)
    kx, k1, k2, k3, k4, k5 = jax.random.split(key, 6)
    x = jax.random.normal(kx, (B, nH, nW, C), dtype=jnp.float32)
    params = dict(
        w_qkv=0.1 * jax.random.normal(k1, (C, 3 * C), dtype=jnp.float32),
        b_qkv=0.1 * jax.random.normal(k2, (3 * C,), dtype=jnp.float32),
        w_proj=0.1 * jax.random.normal(k3, (C, C), dtype=jnp.float32),
        b_proj=0.1 * jax.random.normal(k4, (C,), dtype=jnp.float32),
        rel_pos_bias_table=1.0 * jax.random.normal(
            k5, ((2 * ws - 1) * (2 * ws - 1), H), dtype=jnp.float32),
    )

    out = window_attention(x, params, window_size=ws, num_heads=H)
    out = jax.block_until_ready(out)

    ref = reference_window_attention(x, params, window_size=ws, num_heads=H)
    n_win = B * (nH // ws) * (nW // ws)
    assert out.shape == (n_win, ws * ws, C), out.shape
    err = float(jnp.max(jnp.abs(out - ref)))
    assert jnp.allclose(out, ref, atol=3e-3, rtol=3e-3), f"max abs err {err}"

    print("KERNEL_OK")
</pallas_src>

<mosaic_0001>
module attributes {stable_mosaic.version = 11 : i64} {
  func.func @_fused_wmsa_kernel(%arg0: i32, %arg1: i32, %arg2: memref<8x1x8x32xf32, #tpu.memory_space<vmem>>, %arg3: memref<3x32x32xf32, #tpu.memory_space<vmem>>, %arg4: memref<3x1x32xf32, #tpu.memory_space<vmem>>, %arg5: memref<4x64x64xf32, #tpu.memory_space<vmem>>, %arg6: memref<4x1x32xf32, #tpu.memory_space<vmem>>, %arg7: memref<32x32xf32, #tpu.memory_space<vmem>>, %arg8: memref<1x32xf32, #tpu.memory_space<vmem>>, %arg9: memref<1x64x32xf32, #tpu.memory_space<vmem>>, %arg10: memref<3x8x1x8x32xf32, #tpu.memory_space<vmem>>, %arg11: memref<64x32xf32, #tpu.memory_space<vmem>>) attributes {dimension_semantics = [#tpu.dimension_semantics<parallel>, #tpu.dimension_semantics<parallel>], iteration_bounds = array<i64: 4, 2>, scalar_prefetch = 0 : i64, scratch_operands = 2 : i64, tpu.core_type = #tpu.core_type<tc>, window_params = [{transform_indices = @transform_0, window_bounds = array<i64: 8, 1, 8, 32>}, {pipeline_mode = #tpu.pipeline_mode<synchronous>, transform_indices = @transform_1, window_bounds = array<i64: 3, 32, 32>}, {pipeline_mode = #tpu.pipeline_mode<synchronous>, transform_indices = @transform_2, window_bounds = array<i64: 3, 1, 32>}, {pipeline_mode = #tpu.pipeline_mode<synchronous>, transform_indices = @transform_3, window_bounds = array<i64: 4, 64, 64>}, {pipeline_mode = #tpu.pipeline_mode<synchronous>, transform_indices = @transform_4, window_bounds = array<i64: 4, 1, 32>}, {pipeline_mode = #tpu.pipeline_mode<synchronous>, transform_indices = @transform_5, window_bounds = array<i64: 32, 32>}, {pipeline_mode = #tpu.pipeline_mode<synchronous>, transform_indices = @transform_6, window_bounds = array<i64: 1, 32>}, {transform_indices = @transform_7, window_bounds = array<i64: 1, 64, 32>}]} {
    %c0 = arith.constant 0 : index
    %c0_0 = arith.constant 0 : index
    %c0_1 = arith.constant 0 : index
    %c0_2 = arith.constant 0 : index
    %0 = vector.load %arg2[%c0, %c0_0, %c0_1, %c0_2] : memref<8x1x8x32xf32, #tpu.memory_space<vmem>>, vector<8x1x8x32xf32>
    %1 = vector.shape_cast %0 : vector<8x1x8x32xf32> to vector<64x32xf32>
    %c0_3 = arith.constant 0 : index
    %c0_4 = arith.constant 0 : index
    %c0_5 = arith.constant 0 : index
    %2 = vector.load %arg3[%c0_3, %c0_4, %c0_5] : memref<3x32x32xf32, #tpu.memory_space<vmem>>, vector<1x32x32xf32>
    %3 = vector.shape_cast %2 : vector<1x32x32xf32> to vector<32x32xf32>
    %cst = arith.constant dense<0.000000e+00> : vector<64x32xf32>
    %4 = tpu.matmul %1, %3, %cst {dimension_numbers = #tpu.dot_dimension_numbers<[1], [0], [0], [1], [0, 0, 1, 1], [], []>} : vector<64x32xf32>, vector<32x32xf32>, vector<64x32xf32> -> vector<64x32xf32>
    %c0_6 = arith.constant 0 : index
    %c0_7 = arith.constant 0 : index
    %c0_8 = arith.constant 0 : index
    %5 = vector.load %arg4[%c0_6, %c0_7, %c0_8] : memref<3x1x32xf32, #tpu.memory_space<vmem>>, vector<1x1x32xf32>
    %6 = vector.shape_cast %5 : vector<1x1x32xf32> to vector<1x32xf32>
    %7 = vector.broadcast %6 : vector<1x32xf32> to vector<64x32xf32>
    %8 = arith.addf %4, %7 : vector<64x32xf32>
    %9 = vector.shape_cast %8 : vector<64x32xf32> to vector<8x1x8x32xf32>
    %c0_9 = arith.constant 0 : index
    %c0_10 = arith.constant 0 : index
    %c0_11 = arith.constant 0 : index
    %c0_12 = arith.constant 0 : index
    %c0_13 = arith.constant 0 : index
    %10 = vector.load %arg10[%c0_9, %c0_10, %c0_11, %c0_12, %c0_13] : memref<3x8x1x8x32xf32, #tpu.memory_space<vmem>>, vector<1x8x1x8x32xf32>
    %11 = vector.shape_cast %10 : vector<1x8x1x8x32xf32> to vector<8x1x8x32xf32>
    %12 = vector.shape_cast %9 : vector<8x1x8x32xf32> to vector<1x8x1x8x32xf32>
    tpu.vector_store %arg10[%c0_9, %c0_10, %c0_11, %c0_12, %c0_13], %12 {strides = array<i32>} : memref<3x8x1x8x32xf32, #tpu.memory_space<vmem>>, vector<1x8x1x8x32xf32>,
    %c1 = arith.constant 1 : index
    %c0_14 = arith.constant 0 : index
    %c0_15 = arith.constant 0 : index
    %13 = vector.load %arg3[%c1, %c0_14, %c0_15] : memref<3x32x32xf32, #tpu.memory_space<vmem>>, vector<1x32x32xf32>
    %14 = vector.shape_cast %13 : vector<1x32x32xf32> to vector<32x32xf32>
    %cst_16 = arith.constant dense<0.000000e+00> : vector<64x32xf32>
    %15 = tpu.matmul %1, %14, %cst_16 {dimension_numbers = #tpu.dot_dimension_numbers<[1], [0], [0], [1], [0, 0, 1, 1], [], []>} : vector<64x32xf32>, vector<32x32xf32>, vector<64x32xf32> -> vector<64x32xf32>
    %c1_17 = arith.constant 1 : index
    %c0_18 = arith.constant 0 : index
    %c0_19 = arith.constant 0 : index
    %16 = vector.load %arg4[%c1_17, %c0_18, %c0_19] : memref<3x1x32xf32, #tpu.memory_space<vmem>>, vector<1x1x32xf32>
    %17 = vector.shape_cast %16 : vector<1x1x32xf32> to vector<1x32xf32>
    %18 = vector.broadcast %17 : vector<1x32xf32> to vector<64x32xf32>
    %19 = arith.addf %15, %18 : vector<64x32xf32>
    %20 = vector.shape_cast %19 : vector<64x32xf32> to vector<8x1x8x32xf32>
    %c1_20 = arith.constant 1 : index
    %c0_21 = arith.constant 0 : index
    %c0_22 = arith.constant 0 : index
    %c0_23 = arith.constant 0 : index
    %c0_24 = arith.constant 0 : index
    %21 = vector.load %arg10[%c1_20, %c0_21, %c0_22, %c0_23, %c0_24] : memref<3x8x1x8x32xf32, #tpu.memory_space<vmem>>, vector<1x8x1x8x32xf32>
    %22 = vector.shape_cast %21 : vector<1x8x1x8x32xf32> to vector<8x1x8x32xf32>
    %23 = vector.shape_cast %20 : vector<8x1x8x32xf32> to vector<1x8x1x8x32xf32>
    tpu.vector_store %arg10[%c1_20, %c0_21, %c0_22, %c0_23, %c0_24], %23 {strides = array<i32>} : memref<3x8x1x8x32xf32, #tpu.memory_space<vmem>>, vector<1x8x1x8x32xf32>,
    %c2 = arith.constant 2 : index
    %c0_25 = arith.constant 0 : index
    %c0_26 = arith.constant 0 : index
    %24 = vector.load %arg3[%c2, %c0_25, %c0_26] : memref<3x32x32xf32, #tpu.memory_space<vmem>>, vector<1x32x32xf32>
    %25 = vector.shape_cast %24 : vector<1x32x32xf32> to vector<32x32xf32>
    %cst_27 = arith.constant dense<0.000000e+00> : vector<64x32xf32>
    %26 = tpu.matmul %1, %25, %cst_27 {dimension_numbers = #tpu.dot_dimension_numbers<[1], [0], [0], [1], [0, 0, 1, 1], [], []>} : vector<64x32xf32>, vector<32x32xf32>, vector<64x32xf32> -> vector<64x32xf32>
    %c2_28 = arith.constant 2 : index
    %c0_29 = arith.constant 0 : index
    %c0_30 = arith.constant 0 : index
    %27 = vector.load %arg4[%c2_28, %c0_29, %c0_30] : memref<3x1x32xf32, #tpu.memory_space<vmem>>, vector<1x1x32xf32>
    %28 = vector.shape_cast %27 : vector<1x1x32xf32> to vector<1x32xf32>
    %29 = vector.broadcast %28 : vector<1x32xf32> to vector<64x32xf32>
    %30 = arith.addf %26, %29 : vector<64x32xf32>
    %31 = vector.shape_cast %30 : vector<64x32xf32> to vector<8x1x8x32xf32>
    %c2_31 = arith.constant 2 : index
    %c0_32 = arith.constant 0 : index
    %c0_33 = arith.constant 0 : index
    %c0_34 = arith.constant 0 : index
    %c0_35 = arith.constant 0 : index
    %32 = vector.load %arg10[%c2_31, %c0_32, %c0_33, %c0_34, %c0_35] : memref<3x8x1x8x32xf32, #tpu.memory_space<vmem>>, vector<1x8x1x8x32xf32>
    %33 = vector.shape_cast %32 : vector<1x8x1x8x32xf32> to vector<8x1x8x32xf32>
    %34 = vector.shape_cast %31 : vector<8x1x8x32xf32> to vector<1x8x1x8x32xf32>
    tpu.vector_store %arg10[%c2_31, %c0_32, %c0_33, %c0_34, %c0_35], %34 {strides = array<i32>} : memref<3x8x1x8x32xf32, #tpu.memory_space<vmem>>, vector<1x8x1x8x32xf32>,
    %c0_36 = arith.constant 0 : index
    %c0_37 = arith.constant 0 : index
    %c0_38 = arith.constant 0 : index
    %c0_39 = arith.constant 0 : index
    %c0_40 = arith.constant 0 : index
    %35 = vector.load %arg10[%c0_36, %c0_37, %c0_38, %c0_39, %c0_40] : memref<3x8x1x8x32xf32, #tpu.memory_space<vmem>>, vector<1x8x1x8x32xf32>
    %36 = vector.shape_cast %35 : vector<1x8x1x8x32xf32> to vector<8x8x32xf32>
    %37 = vector.shape_cast %36 : vector<8x8x32xf32> to vector<64x32xf32>
    %cst_41 = arith.constant 0.353553385 : f32
    %38 = vector.broadcast %cst_41 : f32 to vector<64x32xf32>
    %39 = arith.mulf %37, %38 : vector<64x32xf32>
    %c1_42 = arith.constant 1 : index
    %c0_43 = arith.constant 0 : index
    %c0_44 = arith.constant 0 : index
    %c0_45 = arith.constant 0 : index
    %c0_46 = arith.constant 0 : index
    %40 = vector.load %arg10[%c1_42, %c0_43, %c0_44, %c0_45, %c0_46] : memref<3x8x1x8x32xf32, #tpu.memory_space<vmem>>, vector<1x8x1x8x32xf32>
    %41 = vector.shape_cast %40 : vector<1x8x1x8x32xf32> to vector<8x8x32xf32>
    %42 = vector.shape_cast %41 : vector<8x8x32xf32> to vector<64x32xf32>
    %c2_47 = arith.constant 2 : index
    %c0_48 = arith.constant 0 : index
    %c0_49 = arith.constant 0 : index
    %c0_50 = arith.constant 0 : index
    %c0_51 = arith.constant 0 : index
    %43 = vector.load %arg10[%c2_47, %c0_48, %c0_49, %c0_50, %c0_51] : memref<3x8x1x8x32xf32, #tpu.memory_space<vmem>>, vector<1x8x1x8x32xf32>
    %44 = vector.shape_cast %43 : vector<1x8x1x8x32xf32> to vector<8x8x32xf32>
    %45 = vector.shape_cast %44 : vector<8x8x32xf32> to vector<64x32xf32>
    %cst_52 = arith.constant 0.000000e+00 : f32
    %46 = vector.broadcast %cst_52 : f32 to vector<64x32xf32>
    %c0_53 = arith.constant 0 : index
    %c0_54 = arith.constant 0 : index
    %47 = vector.load %arg11[%c0_53, %c0_54] : memref<64x32xf32, #tpu.memory_space<vmem>>, vector<64x32xf32>
    tpu.vector_store %arg11[%c0_53, %c0_54], %46 {strides = array<i32>} : memref<64x32xf32, #tpu.memory_space<vmem>>, vector<64x32xf32>,
    %c0_55 = arith.constant 0 : index
    %c0_56 = arith.constant 0 : index
    %c0_57 = arith.constant 0 : index
    %48 = vector.load %arg6[%c0_55, %c0_56, %c0_57] : memref<4x1x32xf32, #tpu.memory_space<vmem>>, vector<1x1x32xf32>
    %49 = vector.shape_cast %48 : vector<1x1x32xf32> to vector<1x32xf32>
    %50 = vector.broadcast %49 : vector<1x32xf32> to vector<64x32xf32>
    %51 = arith.mulf %39, %50 : vector<64x32xf32>
    %cst_58 = arith.constant dense<0.000000e+00> : vector<64x64xf32>
    %52 = tpu.matmul %51, %42, %cst_58 {dimension_numbers = #tpu.dot_dimension_numbers<[1], [1], [0], [0], [0, 0, 1, 0], [], []>} : vector<64x32xf32>, vector<64x32xf32>, vector<64x64xf32> -> vector<64x64xf32>
    %c0_59 = arith.constant 0 : index
    %c0_60 = arith.constant 0 : index
    %c0_61 = arith.constant 0 : index
    %53 = vector.load %arg5[%c0_59, %c0_60, %c0_61] : memref<4x64x64xf32, #tpu.memory_space<vmem>>, vector<1x64x64xf32>
    %54 = vector.shape_cast %53 : vector<1x64x64xf32> to vector<64x64xf32>
    %55 = arith.addf %52, %54 : vector<64x64xf32>
    %cst_62 = arith.constant dense<0xFF800000> : vector<64xf32>
    %56 = vector.multi_reduction <maximumf>, %55, %cst_62 [1] : vector<64x64xf32> to vector<64xf32>
    %57 = vector.shape_cast %56 : vector<64xf32> to vector<64x1xf32>
    %58 = vector.broadcast %57 : vector<64x1xf32> to vector<64x64xf32>
    %59 = arith.subf %55, %58 : vector<64x64xf32>
    %60 = math.exp %59 : vector<64x64xf32>
    %cst_63 = arith.constant dense<0.000000e+00> : vector<64xf32>
    %61 = vector.multi_reduction <add>, %60, %cst_63 [1] : vector<64x64xf32> to vector<64xf32>
    %62 = vector.shape_cast %61 : vector<64xf32> to vector<64x1xf32>
    %63 = tpu.reciprocal %62 {approx = true} : vector<64x1xf32> -> vector<64x1xf32>
    %64 = vector.broadcast %63 : vector<64x1xf32> to vector<64x64xf32>
    %65 = arith.mulf %60, %64 : vector<64x64xf32>
    %c0_64 = arith.constant 0 : index
    %c0_65 = arith.constant 0 : index
    %66 = vector.load %arg11[%c0_64, %c0_65] : memref<64x32xf32, #tpu.memory_space<vmem>>, vector<64x32xf32>
    %67 = vector.broadcast %49 : vector<1x32xf32> to vector<64x32xf32>
    %68 = arith.mulf %45, %67 : vector<64x32xf32>
    %cst_66 = arith.constant dense<0.000000e+00> : vector<64x32xf32>
    %69 = tpu.matmul %65, %68, %cst_66 {dimension_numbers = #tpu.dot_dimension_numbers<[1], [0], [0], [1], [0, 0, 1, 1], [], []>} : vector<64x64xf32>, vector<64x32xf32>, vector<64x32xf32> -> vector<64x32xf32>
    %70 = arith.addf %66, %69 : vector<64x32xf32>
    %c0_67 = arith.constant 0 : index
    %c0_68 = arith.constant 0 : index
    %71 = vector.load %arg11[%c0_67, %c0_68] : memref<64x32xf32, #tpu.memory_space<vmem>>, vector<64x32xf32>
    tpu.vector_store %arg11[%c0_67, %c0_68], %70 {strides = array<i32>} : memref<64x32xf32, #tpu.memory_space<vmem>>, vector<64x32xf32>,
    %c1_69 = arith.constant 1 : index
    %c0_70 = arith.constant 0 : index
    %c0_71 = arith.constant 0 : index
    %72 = vector.load %arg6[%c1_69, %c0_70, %c0_71] : memref<4x1x32xf32, #tpu.memory_space<vmem>>, vector<1x1x32xf32>
    %73 = vector.shape_cast %72 : vector<1x1x32xf32> to vector<1x32xf32>
    %74 = vector.broadcast %73 : vector<1x32xf32> to vector<64x32xf32>
    %75 = arith.mulf %39, %74 : vector<64x32xf32>
    %cst_72 = arith.constant dense<0.000000e+00> : vector<64x64xf32>
    %76 = tpu.matmul %75, %42, %cst_72 {dimension_numbers = #tpu.dot_dimension_numbers<[1], [1], [0], [0], [0, 0, 1, 0], [], []>} : vector<64x32xf32>, vector<64x32xf32>, vector<64x64xf32> -> vector<64x64xf32>
    %c1_73 = arith.constant 1 : index
    %c0_74 = arith.constant 0 : index
    %c0_75 = arith.constant 0 : index
    %77 = vector.load %arg5[%c1_73, %c0_74, %c0_75] : memref<4x64x64xf32, #tpu.memory_space<vmem>>, vector<1x64x64xf32>
    %78 = vector.shape_cast %77 : vector<1x64x64xf32> to vector<64x64xf32>
    %79 = arith.addf %76, %78 : vector<64x64xf32>
    %cst_76 = arith.constant dense<0xFF800000> : vector<64xf32>
    %80 = vector.multi_reduction <maximumf>, %79, %cst_76 [1] : vector<64x64xf32> to vector<64xf32>
    %81 = vector.shape_cast %80 : vector<64xf32> to vector<64x1xf32>
    %82 = vector.broadcast %81 : vector<64x1xf32> to vector<64x64xf32>
    %83 = arith.subf %79, %82 : vector<64x64xf32>
    %84 = math.exp %83 : vector<64x64xf32>
    %cst_77 = arith.constant dense<0.000000e+00> : vector<64xf32>
    %85 = vector.multi_reduction <add>, %84, %cst_77 [1] : vector<64x64xf32> to vector<64xf32>
    %86 = vector.shape_cast %85 : vector<64xf32> to vector<64x1xf32>
    %87 = tpu.reciprocal %86 {approx = true} : vector<64x1xf32> -> vector<64x1xf32>
    %88 = vector.broadcast %87 : vector<64x1xf32> to vector<64x64xf32>
    %89 = arith.mulf %84, %88 : vector<64x64xf32>
    %c0_78 = arith.constant 0 : index
    %c0_79 = arith.constant 0 : index
    %90 = vector.load %arg11[%c0_78, %c0_79] : memref<64x32xf32, #tpu.memory_space<vmem>>, vector<64x32xf32>
    %91 = vector.broadcast %73 : vector<1x32xf32> to vector<64x32xf32>
    %92 = arith.mulf %45, %91 : vector<64x32xf32>
    %cst_80 = arith.constant dense<0.000000e+00> : vector<64x32xf32>
    %93 = tpu.matmul %89, %92, %cst_80 {dimension_numbers = #tpu.dot_dimension_numbers<[1], [0], [0], [1], [0, 0, 1, 1], [], []>} : vector<64x64xf32>, vector<64x32xf32>, vector<64x32xf32> -> vector<64x32xf32>
    %94 = arith.addf %90, %93 : vector<64x32xf32>
    %c0_81 = arith.constant 0 : index
    %c0_82 = arith.constant 0 : index
    %95 = vector.load %arg11[%c0_81, %c0_82] : memref<64x32xf32, #tpu.memory_space<vmem>>, vector<64x32xf32>
    tpu.vector_store %arg11[%c0_81, %c0_82], %94 {strides = array<i32>} : memref<64x32xf32, #tpu.memory_space<vmem>>, vector<64x32xf32>,
    %c2_83 = arith.constant 2 : index
    %c0_84 = arith.constant 0 : index
    %c0_85 = arith.constant 0 : index
    %96 = vector.load %arg6[%c2_83, %c0_84, %c0_85] : memref<4x1x32xf32, #tpu.memory_space<vmem>>, vector<1x1x32xf32>
    %97 = vector.shape_cast %96 : vector<1x1x32xf32> to vector<1x32xf32>
    %98 = vector.broadcast %97 : vector<1x32xf32> to vector<64x32xf32>
    %99 = arith.mulf %39, %98 : vector<64x32xf32>
    %cst_86 = arith.constant dense<0.000000e+00> : vector<64x64xf32>
    %100 = tpu.matmul %99, %42, %cst_86 {dimension_numbers = #tpu.dot_dimension_numbers<[1], [1], [0], [0], [0, 0, 1, 0], [], []>} : vector<64x32xf32>, vector<64x32xf32>, vector<64x64xf32> -> vector<64x64xf32>
    %c2_87 = arith.constant 2 : index
    %c0_88 = arith.constant 0 : index
    %c0_89 = arith.constant 0 : index
    %101 = vector.load %arg5[%c2_87, %c0_88, %c0_89] : memref<4x64x64xf32, #tpu.memory_space<vmem>>, vector<1x64x64xf32>
    %102 = vector.shape_cast %101 : vector<1x64x64xf32> to vector<64x64xf32>
    %103 = arith.addf %100, %102 : vector<64x64xf32>
    %cst_90 = arith.constant dense<0xFF800000> : vector<64xf32>
    %104 = vector.multi_reduction <maximumf>, %103, %cst_90 [1] : vector<64x64xf32> to vector<64xf32>
    %105 = vector.shape_cast %104 : vector<64xf32> to vector<64x1xf32>
    %106 = vector.broadcast %105 : vector<64x1xf32> to vector<64x64xf32>
    %107 = arith.subf %103, %106 : vector<64x64xf32>
    %108 = math.exp %107 : vector<64x64xf32>
    %cst_91 = arith.constant dense<0.000000e+00> : vector<64xf32>
    %109 = vector.multi_reduction <add>, %108, %cst_91 [1] : vector<64x64xf32> to vector<64xf32>
    %110 = vector.shape_cast %109 : vector<64xf32> to vector<64x1xf32>
    %111 = tpu.reciprocal %110 {approx = true} : vector<64x1xf32> -> vector<64x1xf32>
    %112 = vector.broadcast %111 : vector<64x1xf32> to vector<64x64xf32>
    %113 = arith.mulf %108, %112 : vector<64x64xf32>
    %c0_92 = arith.constant 0 : index
    %c0_93 = arith.constant 0 : index
    %114 = vector.load %arg11[%c0_92, %c0_93] : memref<64x32xf32, #tpu.memory_space<vmem>>, vector<64x32xf32>
    %115 = vector.broadcast %97 : vector<1x32xf32> to vector<64x32xf32>
    %116 = arith.mulf %45, %115 : vector<64x32xf32>
    %cst_94 = arith.constant dense<0.000000e+00> : vector<64x32xf32>
    %117 = tpu.matmul %113, %116, %cst_94 {dimension_numbers = #tpu.dot_dimension_numbers<[1], [0], [0], [1], [0, 0, 1, 1], [], []>} : vector<64x64xf32>, vector<64x32xf32>, vector<64x32xf32> -> vector<64x32xf32>
    %118 = arith.addf %114, %117 : vector<64x32xf32>
    %c0_95 = arith.constant 0 : index
    %c0_96 = arith.constant 0 : index
    %119 = vector.load %arg11[%c0_95, %c0_96] : memref<64x32xf32, #tpu.memory_space<vmem>>, vector<64x32xf32>
    tpu.vector_store %arg11[%c0_95, %c0_96], %118 {strides = array<i32>} : memref<64x32xf32, #tpu.memory_space<vmem>>, vector<64x32xf32>,
    %c3 = arith.constant 3 : index
    %c0_97 = arith.constant 0 : index
    %c0_98 = arith.constant 0 : index
    %120 = vector.load %arg6[%c3, %c0_97, %c0_98] : memref<4x1x32xf32, #tpu.memory_space<vmem>>, vector<1x1x32xf32>
    %121 = vector.shape_cast %120 : vector<1x1x32xf32> to vector<1x32xf32>
    %122 = vector.broadcast %121 : vector<1x32xf32> to vector<64x32xf32>
    %123 = arith.mulf %39, %122 : vector<64x32xf32>
    %cst_99 = arith.constant dense<0.000000e+00> : vector<64x64xf32>
    %124 = tpu.matmul %123, %42, %cst_99 {dimension_numbers = #tpu.dot_dimension_numbers<[1], [1], [0], [0], [0, 0, 1, 0], [], []>} : vector<64x32xf32>, vector<64x32xf32>, vector<64x64xf32> -> vector<64x64xf32>
    %c3_100 = arith.constant 3 : index
    %c0_101 = arith.constant 0 : index
    %c0_102 = arith.constant 0 : index
    %125 = vector.load %arg5[%c3_100, %c0_101, %c0_102] : memref<4x64x64xf32, #tpu.memory_space<vmem>>, vector<1x64x64xf32>
    %126 = vector.shape_cast %125 : vector<1x64x64xf32> to vector<64x64xf32>
    %127 = arith.addf %124, %126 : vector<64x64xf32>
    %cst_103 = arith.constant dense<0xFF800000> : vector<64xf32>
    %128 = vector.multi_reduction <maximumf>, %127, %cst_103 [1] : vector<64x64xf32> to vector<64xf32>
    %129 = vector.shape_cast %128 : vector<64xf32> to vector<64x1xf32>
    %130 = vector.broadcast %129 : vector<64x1xf32> to vector<64x64xf32>
    %131 = arith.subf %127, %130 : vector<64x64xf32>
    %132 = math.exp %131 : vector<64x64xf32>
    %cst_104 = arith.constant dense<0.000000e+00> : vector<64xf32>
    %133 = vector.multi_reduction <add>, %132, %cst_104 [1] : vector<64x64xf32> to vector<64xf32>
    %134 = vector.shape_cast %133 : vector<64xf32> to vector<64x1xf32>
    %135 = tpu.reciprocal %134 {approx = true} : vector<64x1xf32> -> vector<64x1xf32>
    %136 = vector.broadcast %135 : vector<64x1xf32> to vector<64x64xf32>
    %137 = arith.mulf %132, %136 : vector<64x64xf32>
    %c0_105 = arith.constant 0 : index
    %c0_106 = arith.constant 0 : index
    %138 = vector.load %arg11[%c0_105, %c0_106] : memref<64x32xf32, #tpu.memory_space<vmem>>, vector<64x32xf32>
    %139 = vector.broadcast %121 : vector<1x32xf32> to vector<64x32xf32>
    %140 = arith.mulf %45, %139 : vector<64x32xf32>
    %cst_107 = arith.constant dense<0.000000e+00> : vector<64x32xf32>
    %141 = tpu.matmul %137, %140, %cst_107 {dimension_numbers = #tpu.dot_dimension_numbers<[1], [0], [0], [1], [0, 0, 1, 1], [], []>} : vector<64x64xf32>, vector<64x32xf32>, vector<64x32xf32> -> vector<64x32xf32>
    %142 = arith.addf %138, %141 : vector<64x32xf32>
    %c0_108 = arith.constant 0 : index
    %c0_109 = arith.constant 0 : index
    %143 = vector.load %arg11[%c0_108, %c0_109] : memref<64x32xf32, #tpu.memory_space<vmem>>, vector<64x32xf32>
    tpu.vector_store %arg11[%c0_108, %c0_109], %142 {strides = array<i32>} : memref<64x32xf32, #tpu.memory_space<vmem>>, vector<64x32xf32>,
    %c0_110 = arith.constant 0 : index
    %c0_111 = arith.constant 0 : index
    %144 = vector.load %arg11[%c0_110, %c0_111] : memref<64x32xf32, #tpu.memory_space<vmem>>, vector<64x32xf32>
    %c0_112 = arith.constant 0 : index
    %c0_113 = arith.constant 0 : index
    %145 = vector.load %arg7[%c0_112, %c0_113] : memref<32x32xf32, #tpu.memory_space<vmem>>, vector<32x32xf32>
    %cst_114 = arith.constant dense<0.000000e+00> : vector<64x32xf32>
    %146 = tpu.matmul %144, %145, %cst_114 {dimension_numbers = #tpu.dot_dimension_numbers<[1], [0], [0], [1], [0, 0, 1, 1], [], []>} : vector<64x32xf32>, vector<32x32xf32>, vector<64x32xf32> -> vector<64x32xf32>
    %c0_115 = arith.constant 0 : index
    %c0_116 = arith.constant 0 : index
    %147 = vector.load %arg8[%c0_115, %c0_116] : memref<1x32xf32, #tpu.memory_space<vmem>>, vector<1x32xf32>
    %148 = vector.broadcast %147 : vector<1x32xf32> to vector<64x32xf32>
    %149 = arith.addf %146, %148 : vector<64x32xf32>
    %c0_117 = arith.constant 0 : index
    %c0_118 = arith.constant 0 : index
    %c0_119 = arith.constant 0 : index
    %150 = vector.load %arg9[%c0_117, %c0_118, %c0_119] : memref<1x64x32xf32, #tpu.memory_space<vmem>>, vector<1x64x32xf32>
    %151 = vector.shape_cast %150 : vector<1x64x32xf32> to vector<64x32xf32>
    %152 = vector.shape_cast %149 : vector<64x32xf32> to vector<1x64x32xf32>
    tpu.vector_store %arg9[%c0_117, %c0_118, %c0_119], %152 {strides = array<i32>} : memref<1x64x32xf32, #tpu.memory_space<vmem>>, vector<1x64x32xf32>,
    return
  }
  func.func @transform_0(%arg0: i32, %arg1: i32) -> (i32, i32, i32, i32) {
    %c0_i32 = arith.constant 0 : i32
    %c0_i32_0 = arith.constant 0 : i32
    %c0_i32_1 = arith.constant 0 : i32
    return %arg0, %arg1, %c0_i32, %c0_i32_0 : i32, i32, i32, i32
  }
  func.func @transform_1(%arg0: i32, %arg1: i32) -> (i32, i32, i32) {
    %c0_i32 = arith.constant 0 : i32
    %c0_i32_0 = arith.constant 0 : i32
    %c0_i32_1 = arith.constant 0 : i32
    %c0_i32_2 = arith.constant 0 : i32
    return %c0_i32, %c0_i32_0, %c0_i32_1 : i32, i32, i32
  }
  func.func @transform_2(%arg0: i32, %arg1: i32) -> (i32, i32, i32) {
    %c0_i32 = arith.constant 0 : i32
    %c0_i32_0 = arith.constant 0 : i32
    %c0_i32_1 = arith.constant 0 : i32
    %c0_i32_2 = arith.constant 0 : i32
    return %c0_i32, %c0_i32_0, %c0_i32_1 : i32, i32, i32
  }
  func.func @transform_3(%arg0: i32, %arg1: i32) -> (i32, i32, i32) {
    %c0_i32 = arith.constant 0 : i32
    %c0_i32_0 = arith.constant 0 : i32
    %c0_i32_1 = arith.constant 0 : i32
    %c0_i32_2 = arith.constant 0 : i32
    return %c0_i32, %c0_i32_0, %c0_i32_1 : i32, i32, i32
  }
  func.func @transform_4(%arg0: i32, %arg1: i32) -> (i32, i32, i32) {
    %c0_i32 = arith.constant 0 : i32
    %c0_i32_0 = arith.constant 0 : i32
    %c0_i32_1 = arith.constant 0 : i32
    %c0_i32_2 = arith.constant 0 : i32
    return %c0_i32, %c0_i32_0, %c0_i32_1 : i32, i32, i32
  }
  func.func @transform_5(%arg0: i32, %arg1: i32) -> (i32, i32) {
    %c0_i32 = arith.constant 0 : i32
    %c0_i32_0 = arith.constant 0 : i32
    %c0_i32_1 = arith.constant 0 : i32
    return %c0_i32, %c0_i32_0 : i32, i32
  }
  func.func @transform_6(%arg0: i32, %arg1: i32) -> (i32, i32) {
    %c0_i32 = arith.constant 0 : i32
    %c0_i32_0 = arith.constant 0 : i32
    %c0_i32_1 = arith.constant 0 : i32
    return %c0_i32, %c0_i32_0 : i32, i32
  }
  func.func @transform_7(%arg0: i32, %arg1: i32) -> (i32, i32, i32) {
    %c2_i32 = arith.constant 2 : i32
    %0 = arith.muli %arg0, %c2_i32 : i32
    %1 = arith.addi %0, %arg1 : i32
    %c0_i32 = arith.constant 0 : i32
    %c0_i32_0 = arith.constant 0 : i32
    %c0_i32_1 = arith.constant 0 : i32
    return %1, %c0_i32, %c0_i32_0 : i32, i32, i32
  }
}

</mosaic_0001>

<bundles_post_ra>
// kernel: tpu_custom_call.1
= control target key start
LH: loop header
LB: loop body
LE: loop exit
PB: predicated region body
PF: predicated region fallthrough
CT: control target
= control target key end

     0   :  { %s4876_s0 = inlined_call_operand.hbm [shape: f32[32,2,8,32], index: 0, kind: input, shape index: {}]   ;;  %s4877_s1 = inlined_call_operand.hbm [shape: f32[3,32,32], index: 1, kind: input, shape index: {}]   ;;  %s4878_s2 = inlined_call_operand.vmem [shape: f32[3,1,32], index: 2, kind: input, shape index: {}]   ;;  %s4879_s3 = inlined_call_operand.hbm [shape: f32[4,64,64], index: 3, kind: input, shape index: {}]   ;;  %s4880_s4 = inlined_call_operand.vmem [shape: f32[4,1,32], index: 4, kind: input, shape index: {}]   ;;  %s4881_s5 = inlined_call_operand.hbm [shape: f32[32,32], index: 5, kind: input, shape index: {}]   ;;  %s4882_s6 = inlined_call_operand.vmem [shape: f32[1,32], index: 6, kind: input, shape index: {}]   ;;  %s4883_s7 = inlined_call_operand.vmem [shape: f32[8,64,32], index: 7, kind: output, shape index: {}]  }
   0x1   :  { %4891 = sst [smem:[#allocation15_spill]] %s4877_s1 }
   0x2   :  { %4892 = sst [smem:[#allocation16_spill]] %s4882_s6 }
   0x3   :  { %4893 = sst [smem:[#allocation17_spill]] %s4883_s7 }
   0x4   :  { %12 = vsyncpa [#allocation5], 0 }
   0x5   :  { %14 = vsyncpa [#allocation5 + $0x1], 0 }
   0x6   :  { %15 = vsyncpa [#allocation7], 0 }
   0x7   :  { %16 = vsyncpa [#allocation10], 0  ;;  %s4037_s24 = smov 0   ;;  %s4039_s25 = smov 0  }
   0x8   :  { %s4041_s26 = smov 0   ;;  %s4043_s27 = smov 0  }
   0x9   :  { %s4045_s28 = smov 0   ;;  %s4047_s29 = smov 0  }
   0xa   :  { %s4049_s30 = smov 0   ;;  %s4051_s8 = smov 0  }
   0xb LB: > { %4894 = sst [smem:[#allocation14_spill]] %s3987_s8  ;;  %s2727_s9 = sadd.s32 4294967295, %s3987_s8   ;;  %s3987_s8 = sphi %s4051_s8, %s22_s8   ;;  %s3983_s30 = sphi %s4049_s30, %s4919_s30   ;;  %s3979_s29 = sphi %s4047_s29, %s4918_s29   ;;  %s3975_s28 = sphi %s4045_s28, %s4917_s28   ;;  %s3971_s27 = sphi %s4043_s27, %s4916_s27   ;;  %s3967_s26 = sphi %s4041_s26, %s4915_s26   ;;  %s3963_s25 = sphi %s4039_s25, %s4914_s25   ;;  %s3959_s24 = sphi %s4037_s24, %s4913_s24  }
   0xc   : > { %p50_p0 = scmp.ne.s32.totalorder %s3967_s26, %s3963_s25  ;;  %p51_p1 = scmp.eq.s32.totalorder %s3987_s8, 0 }
   0xd   : > { %p56_p2 = scmp.ne.s32.totalorder %s3963_s25, %s3959_s24  ;;  %p4081_p3 = scmp.eq.s32.totalorder %s2727_s9, 0 }
   0xe   : > { %p52_p4 = por %p51_p1, %p50_p0  ;;  %p2731_p5 = scmp.ge.s32.totalorder %s3987_s8, 1 }
   0xf   : > { %s4895_s11 = scalar_select %p4081_p3, 1, 0 }
  0x10   : > { %p4088_p6 = por %p4081_p3, %p56_p2  ;;  %p223_p7 = scmp.lt.s32.totalorder %s3987_s8, 9 }
  0x11   : > { %s3989_s14 = smov [#allocation6]   ;;  %p3596_p10 = scmp.lt.s32.totalorder %s3987_s8, 8 }
  0x12   : > { %s4896_s12 = scalar_select %p4088_p6, 1, 0 }
  0x13   : > { %p4093_p8 = pnand %p2731_p5, %p223_p7  ;;  %s235_s15 = sshll.u32 %s3989_s14, 4  ;;  %s4097_s15 = int_to_ptr.vmem [resolvable:$true] %s235_s15 }
  0x14   : > { %p4108_p12 = pnand %p3596_p10, %p52_p4  ;;  %s3990_s18 = smov [#allocation8]  }
  0x15   : > { %s4897_s13 = scalar_select %p4093_p8, 1, 0 }
  0x16   : > { %p3579_p9 = pneg %p4093_p8  ;;  %s251_s19 = sshll.u32 %s3990_s18, 4  ;;  %s4112_s19 = int_to_ptr.vmem [resolvable:$true] %s251_s19 }
  0x17   : > { %s4899_s17 = scalar_select %p4108_p12, 1, 0 }
  0x18   : > { %p4104_p11 = pnand %p3579_p9, %p4081_p3  ;;  %s4900_s1 = sld [smem:[#allocation15_spill]] }
  0x1a   : > { %p4122_p0 = pneg %p4104_p11 }
  0x1e   : > { %s3799_s22 = scalar_lea.hbm %s4900_s1, 1536 }
  0x1f   : > { %p3800_p13 = scmp.ne.s32.totalorder %s4900_s1, %s3799_s22  ;;  %p3806_p4 = scmp.lt.u32.totalorder %s3799_s22, %s4900_s1 }
  0x21   : > { %p3802_p1 = pnand %p4122_p0, %p3800_p13 }
  0x23   : > { %p3803_p2 = pneg %p3802_p1 }
  0x25   : > { %p3808_p5 = pnand %p3806_p4, %p3803_p2 }
  0x27   : > { %3811 = shalt.err (!%p3808_p5)
}
  0x28   : > { %s3812_s20 = scalar_lea.vmem %s4097_s15, 1536  ;;  %p3820_p3 = scmp.lt.s32.totalorder %s4097_s15, %s4097_s15 }
  0x29   : > { %p3813_p7 = scmp.ne.s32.totalorder %s4097_s15, %s3812_s20  ;;  %p3821_p6 = scmp.lt.s32.totalorder %s3812_s20, %s3812_s20 }
  0x2b   : > { %p3815_p9 = pnand %p3813_p7, %p4122_p0  ;;  %p3822_p13 = por %p3821_p6, %p3820_p3 }
  0x2d   : > { %p3816_p10 = pneg %p3815_p9 }
  0x2f   : > { %p3823_p1 = pnand %p3822_p13, %p3816_p10 }
  0x31   : > { %3826 = shalt.err (!%p3823_p1)
}
  0x32   : > { %s4890_s21 = smov 128   ;;  %s3992_s22 = smov 8  }
  0x33   : > { %3582 = dma.hbm_to_vmem [thread:$0]  (!%p4104_p11), %s4900_s1, 1536, %s4097_s15, [#allocation7], %s4890_s21, %s4890_s21, %s3992_s22  }
  0x34   : > { %s3827_s20 = scalar_lea.hbm %s4879_s3, 4096 }
  0x35   : > { %p3828_p3 = scmp.ne.s32.totalorder %s4879_s3, %s3827_s20  ;;  %p3834_p4 = scmp.lt.u32.totalorder %s3827_s20, %s4879_s3 }
  0x37   : > { %p3830_p6 = pnand %p3828_p3, %p4122_p0 }
  0x39   : > { %p3831_p2 = pneg %p3830_p6 }
  0x3b   : > { %p3836_p5 = pnand %p3834_p4, %p3831_p2 }
  0x3d   : > { %3839 = shalt.err (!%p3836_p5)
}
  0x3e   : > { %s3840_s15 = scalar_lea.vmem %s4112_s19, 4096  ;;  %p3848_p13 = scmp.lt.s32.totalorder %s4112_s19, %s4112_s19 }
  0x3f   : > { %p3841_p7 = scmp.ne.s32.totalorder %s4112_s19, %s3840_s15  ;;  %p3849_p1 = scmp.lt.s32.totalorder %s3840_s15, %s3840_s15 }
  0x41   : > { %p3843_p9 = pnand %p3841_p7, %p4122_p0  ;;  %p3850_p3 = por %p3849_p1, %p3848_p13 }
  0x43   : > { %p3844_p10 = pneg %p3843_p9 }
  0x45   : > { %p3851_p6 = pnand %p3850_p3, %p3844_p10 }
  0x47   : > { %3854 = shalt.err (!%p3851_p6)
}
  0x48   : > { %3585 = dma.hbm_to_vmem [thread:$0]  (!%p4104_p11), %s4879_s3, 4096, %s4112_s19, [#allocation7], %s4890_s21, %s4890_s21, %s3992_s22  }
  0x49   : > { %s3993_s8 = smov [#allocation9]   ;;  %s3855_s14 = scalar_lea.hbm %s4881_s5, 512 }
  0x4a   : > { %s267_s10 = sshll.u32 %s3993_s8, 4  ;;  %p3856_p2 = scmp.ne.s32.totalorder %s4881_s5, %s3855_s14  ;;  %s268_s10 = int_to_ptr.vmem [resolvable:$true] %s267_s10 }
  0x4b   : > { %p3862_p7 = scmp.lt.u32.totalorder %s3855_s14, %s4881_s5 }
  0x4c   : > { %p3858_p4 = pnand %p3856_p2, %p4122_p0 }
  0x4e   : > { %p3859_p5 = pneg %p3858_p4 }
  0x50   : > { %p3864_p9 = pnand %p3862_p7, %p3859_p5 }
  0x52   : > { %3867 = shalt.err (!%p3864_p9)
}
  0x53   : > { %s3868_s19 = scalar_lea.vmem %s268_s10, 512  ;;  %p3876_p3 = scmp.lt.s32.totalorder %s268_s10, %s268_s10 }
  0x54   : > { %p3869_p10 = scmp.ne.s32.totalorder %s268_s10, %s3868_s19  ;;  %p3877_p6 = scmp.lt.s32.totalorder %s3868_s19, %s3868_s19 }
  0x56   : > { %p3871_p13 = pnand %p3869_p10, %p4122_p0  ;;  %p3878_p8 = por %p3877_p6, %p3876_p3 }
  0x58   : > { %p3872_p1 = pneg %p3871_p13 }
  0x5a   : > { %p3879_p12 = pnand %p3878_p8, %p3872_p1 }
  0x5c   : > { %3882 = shalt.err (!%p3879_p12)
}
  0x5d   : > { %3588 = dma.hbm_to_vmem [thread:$0]  (!%p4104_p11), %s4881_s5, 512, %s268_s10, [#allocation10], %s4890_s21, %s4890_s21, %s3992_s22  }
  0x5e   : > { %s31_s9 = sadd.s32 1, %s3979_s29  ;;  %s34_s7 = sadd.s32 1, %s3983_s30 }
  0x5f   : > { %p32_p8 = scmp.ge.s32.totalorder %s31_s9, 2  ;;  %s284_s8 = sand.u32 1, %s3967_s26  }
  0x60   : > { %s2736_s16 = sshll.u32 %s284_s8, 6  ;;  %s2891_s24 = sshll.u32 %s3983_s30, 4 }
  0x61   : > { %s4921_s9 = smov (%p32_p8, %s31_s9), 0  ;;  %s4923_s7 = smov (!%p32_p8, %s34_s7), %s3983_s30 }
  0x62   : > { %s39_s23 = ssub.s32 %s3979_s29, %s4921_s9  ;;  %p36_p12 = scmp.ge.s32.totalorder %s4923_s7, 4 }
  0x63   : > { %s294_s14 = sadd.s32 %s3979_s29, %s2891_s24  ;;  %s288_s18 = scalar_lea.vmem [#allocation4], %s2736_s16 }
  0x64   : > { %s297_s20 = sshll.u32 %s288_s18, 4  ;;  %s4925_s7 = smov (%p36_p12, %s4923_s7), 0  ;;  %s4205_s20 = int_to_ptr.vmem [resolvable:$true] %s297_s20 }
  0x65   : > { %s2739_s10 = sshll.u32 %s294_s14, 7  ;;  %s38_s15 = ssub.s32 %s3983_s30, %s4925_s7 }
  0x66   : > { %s4212_s6 = scalar_lea.hbm %s4876_s0, %s2739_s10  ;;  %s4214_s21 = sor.u32 %s39_s23, %s38_s15 }
  0x67   : > { %p41_p11 = scmp.eq.s32.totalorder %s4214_s21, 0  ;;  %s4217_s16 = scalar_lea.sflag [#allocation5], %s284_s8 }
  0x68   : > { %s3883_s24 = scalar_lea.hbm %s4212_s6, 1024  ;;  %p4902_p2 = scmp.ne.s32.totalorder %s4899_s17, 0 }
  0x69   : > { %p3884_p0 = scmp.ne.s32.totalorder %s4212_s6, %s3883_s24  ;;  %s3888_s10 = scalar_lea.hbm %s4876_s0, 8192 }
  0x6a   : > { %p3885_p4 = pneg %p4902_p2  ;;  %p3889_p9 = scmp.lt.u32.totalorder %s4212_s6, %s4876_s0 }
  0x6b   : > { %p3890_p10 = scmp.lt.u32.totalorder %s3888_s10, %s3883_s24  ;;  %p3892_p1 = scmp.lt.u32.totalorder %s3883_s24, %s4212_s6 }
  0x6c   : > { %p3886_p5 = pnand %p3885_p4, %p3884_p0 }
  0x6d   : > { %p3891_p13 = por %p3890_p10, %p3889_p9 }
  0x6e   : > { %p3887_p7 = pneg %p3886_p5 }
  0x6f   : > { %p3893_p3 = por %p3892_p1, %p3891_p13 }
  0x71   : > { %p3894_p6 = pnand %p3893_p3, %p3887_p7 }
  0x73   : > { %3897 = shalt.err (!%p3894_p6)
}
  0x74   : > { %s3898_s8 = scalar_lea.vmem %s4205_s20, 1024  ;;  %s3994_s23 = smov [#allocation4]  }
  0x75   : > { %p3899_p8 = scmp.ne.s32.totalorder %s4205_s20, %s3898_s8  ;;  %s3903_s15 = sshll.u32 %s3994_s23, 4  ;;  %s3904_s15 = int_to_ptr.vmem [resolvable:$false] %s3903_s15 }
  0x76   : > { %s3905_s14 = scalar_lea.vmem %s3904_s15, 2048  ;;  %p3906_p5 = scmp.lt.s32.totalorder %s4205_s20, %s3904_s15 }
  0x77   : > { %p3901_p12 = pnand %p3899_p8, %p3885_p4  ;;  %p3907_p9 = scmp.lt.s32.totalorder %s3905_s14, %s3898_s8 }
  0x79   : > { %p3902_p0 = pneg %p3901_p12  ;;  %p3908_p10 = por %p3907_p9, %p3906_p5 }
  0x7b   : > { %p3909_p13 = pnand %p3908_p10, %p3902_p0 }
  0x7d   : > { %3912 = shalt.err (!%p3909_p13)
}
  0x7e   : > { %s3995_s24 = smov 256   ;;  %s4903_s18 = smov 128  }
  0x7f   : > { %3592 = dma.hbm_to_vmem [thread:$0]  (!%p4902_p2), %s4212_s6, 1024, %s4205_s20, %s4217_s16, %s3995_s24, %s4903_s18, %s3992_s22  }
  0x80   : > { %s4904_s10 = sadd.s32 1, %s3967_s26  ;;  %p4905_p4 = scmp.ne.s32.totalorder %s4897_s13, 0 }
  0x81   : > { %s4252_s19 = scalar_select %p41_p11, %s3967_s26, %s4904_s10  }
  0x82   : > { %309 = sbr.rel (%p4905_p4) target bundleno = 3084 (0xc0c), region = 48  ;;  %s311_s1 = sand.u32 (!%p4905_p4), 1, %s3963_s25  }
  0x83   : > { %s2741_s17 = sshll.u32 (!%p4905_p4), %s311_s1, 6  ;;  %s312_s8 = scalar_lea.sflag (!%p4905_p4), [#allocation5], %s311_s1 }
  0x84   : > { %s4257_s23 = scalar_lea.vmem (!%p4905_p4), [#allocation4], %s2741_s17  ;;  %p4906_p7 = scmp.ne.s32.totalorder (!%p4905_p4), %s4896_s12, 0 }
  0x89   : > { %3946 = dma.done.wait (%p4906_p7), %s312_s8, 1024  }
  0x8a   : > { %3948 = vsyncadd (%p4906_p7), %s312_s8, 4294966272  ;;  %p4907_p2 = scmp.ne.s32.totalorder %s4895_s11, 0 }
  0x8c   : > { %3950 = dma.done.wait (%p4907_p2), [#allocation7], 5632  }
  0x8d   : > { %3952 = vsyncadd (%p4907_p2), [#allocation7], 4294961664 }
  0x8e   : > { %3954 = dma.done.wait (%p4907_p2), [#allocation10], 512  }
  0x8f   : > { %3956 = vsyncadd (%p4907_p2), [#allocation10], 4294966784  ;;  %v378_v0 = vld [vmem:[#allocation6] sm:$0xff]  ;;  %v379_v1 = vld [vmem:[#allocation6 + $0x8] sm:$0xff]  ;;  %vm389_vm0 = vcmask 261120   ;;  %vm997_vm2 = vcmask 523264  }
  0x90   : > { %v528_v2 = vld [vmem:[#allocation6 + $0x20] sm:$0xff]  ;;  %v3373_v3 = vpack.c.bf16 %v379_v1, %v378_v0  ;;  %v529_v4 = vld [vmem:[#allocation6 + $0x28] sm:$0xff]  ;;  %v380_v5 = vld [vmem:[#allocation6 + $0x10] sm:$0xff]  ;;  %s2745_s17 = sshll.u32 %s3975_s28, 1  ;;  %s4910_s13 = sld [smem:[#allocation16_spill]] }
  0x91   : > { %v381_v6 = vld [vmem:[#allocation6 + $0x18] sm:$0xff]  ;;  %v3381_v7 = vpack.c.bf16 %v529_v4, %v528_v2  ;;  %v530_v9 = vld [vmem:[#allocation6 + $0x30] sm:$0xff]  ;;  %v370_v11 = vld [vmem:[%s4257_s23] sm:$0xff]  ;;  %s362_s8 = sadd.s32 %s3971_s27, %s2745_s17  ;;  %s4911_s20 = sld [smem:[#allocation17_spill]] }
  0x92   : > { %v3377_v8 = vpack.c.bf16 %v381_v6, %v380_v5  ;;  %v531_v10 = vld [vmem:[#allocation6 + $0x38] sm:$0xff]  ;;  %3374 = vmatprep.subr.bf16.mxu0 %v3373_v3  ;;  %3077 = vmatprep.mubr.msk.f32.mxu0 %vm389_vm0, %v370_v11  ;;  %v655_v13 = vld [vmem:[#allocation6 + $0x40] sm:$0xff]  ;;  %v656_v14 = vld [vmem:[#allocation6 + $0x48] sm:$0xff]  ;;  %p363_p11 = scmp.lt.s32.totalorder %s362_s8, 7 }
  0x93   : > { %v3385_v12 = vpack.c.bf16 %v531_v10, %v530_v9  ;;  %3382 = vmatprep.subr.bf16.mxu1 %v3381_v7  ;;  %3376 = vmatpush3.bf16.msra.mxu0 %v3373_v3  ;;  %v3389_v15 = vpack.c.bf16 %v656_v14, %v655_v13  ;;  %v657_v16 = vld [vmem:[#allocation6 + $0x50] sm:$0xff]  ;;  %v658_v17 = vld [vmem:[#allocation6 + $0x58] sm:$0xff]  ;;  %v371_v18 = vld [vmem:[%s4257_s23 + $0x8] sm:$0xff] }
  0x94   : > { %3384 = vmatpush3.bf16.msra.mxu1 %v3381_v7  ;;  %3378 = vmatprep.subr.bf16.mxu0 %v3377_v8  ;;  %v372_v19 = vld [vmem:[%s4257_s23 + $0x10] sm:$0xff]  ;;  %v3393_v20 = vpack.c.bf16 %v658_v17, %v657_v16  ;;  %v373_v21 = vld [vmem:[%s4257_s23 + $0x18] sm:$0xff]  ;;  %v374_v22 = vld [vmem:[%s4257_s23 + $0x20] sm:$0xff]  ;;  %s4927_s8 = smov (!%p363_p11, %s362_s8), 7 }
  0x95   : > { %3386 = vmatprep.subr.bf16.mxu1 %v3385_v12  ;;  %3097 = vmatprep.mubr.msk.f32.mxu1 %vm389_vm0, %v370_v11  ;;  %v375_v23 = vld [vmem:[%s4257_s23 + $0x28] sm:$0xff]  ;;  %v376_v24 = vld [vmem:[%s4257_s23 + $0x30] sm:$0xff]  ;;  %v377_v25 = vld [vmem:[%s4257_s23 + $0x38] sm:$0xff]  ;;  %s2892_s23 = sshll.u32 %s4927_s8, 6 }
  0x96   : > { %v2748_v26 = vld [vmem:[%s4878_s2] ss:$0 sm:$0xff]  ;;  %v2758_v27 = vld [vmem:[%s4878_s2 + $0x1] ss:$0 sm:$0xff]  ;;  %vm4328_vm1 = vmpackc.low %vm389_vm0, %vm389_vm0 }
  0x97   : > { %3380 = vmatpush3.bf16.msra.mxu0 %v3377_v8  ;;  %v4320_v52 = vld [vmem:[%s4880_s4 + $0x1] ss:$0 sm:$0xff]  ;;  %v4341_v1 = vld [vmem:[%s4880_s4] ss:$0 sm:$0xff]  ;;  %v4350_v4 = vld [vmem:[%s4878_s2 + $0x2] ss:$0 sm:$0xff]  ;;  %s367_s6 = scalar_lea.vmem %s4911_s20, %s2892_s23 }
  0x98   : > { %3388 = vmatpush3.bf16.msra.mxu1 %v3385_v12  ;;  %3390 = vmatprep.subr.bf16.mxu0 %v3389_v15 }
  0x9a   : > { %3078 = vmatmul.mubr.msk.f32.vlgmr.msra.gmra.mrb[0].mxu0 %vm389_vm0, %v371_v18 }
  0x9b   : > { %3098 = vmatmul.mubr.msk.f32.vlgmr.msra.gmra.mrb[0].mxu1 %vm389_vm0, %v371_v18  ;;  %3080 = vmatprep.mubr.msk.f32.mxu0 %vm389_vm0, %v372_v19 }
  0x9c   : > { %3100 = vmatprep.mubr.msk.f32.mxu1 %vm389_vm0, %v372_v19  ;;  %3392 = vmatpush3.bf16.msra.mxu0 %v3389_v15 }
  0x9d   : > { %3394 = vmatprep.subr.bf16.mxu0 %v3393_v20 }
  0x9e   : > { %3081 = vmatmul.mubr.msk.f32.gmra.mrb[2].mxu0 %vm389_vm0, %v373_v21 }
  0x9f   : > { %3083 = vmatprep.mubr.msk.f32.mxu0 %vm389_vm0, %v374_v22  ;;  %3101 = vmatmul.mubr.msk.f32.gmra.mrb[2].mxu1 %vm389_vm0, %v373_v21 }
  0xa0   : > { %3396 = vmatpush3.bf16.msra.mxu0 %v3393_v20  ;;  %3103 = vmatprep.mubr.msk.f32.mxu1 %vm389_vm0, %v374_v22 }
  0xa2   : > { %3084 = vmatmul.mubr.msk.f32.gmra.mrb[4].mxu0 %vm389_vm0, %v375_v23 }
  0xa3   : > { %3086 = vmatprep.mubr.msk.f32.mxu0 %vm389_vm0, %v376_v24  ;;  %3104 = vmatmul.mubr.msk.f32.gmra.mrb[4].mxu1 %vm389_vm0, %v375_v23 }
  0xa4   : > { %3106 = vmatprep.mubr.msk.f32.mxu1 %vm389_vm0, %v376_v24 }
  0xa6   : > { %3087 = vmatmul.mubr.msk.f32.gmra.mrb[6].mxu0 %vm389_vm0, %v377_v25 }
  0xa7   : > { %3117 = vmatprep.mubr.msk.f32.mxu0 %vm389_vm0, %v370_v11  ;;  %3107 = vmatmul.mubr.msk.f32.gmra.mrb[6].mxu1 %vm389_vm0, %v377_v25 }
  0xaa   : > { %3118 = vmatmul.mubr.msk.f32.vlgmr.msra.gmra.mrb[8].mxu0 %vm389_vm0, %v371_v18 }
  0xab   : > { %3120 = vmatprep.mubr.msk.f32.mxu0 %vm389_vm0, %v372_v19 }
  0xae   : > { %3121 = vmatmul.mubr.msk.f32.gmra.mrb[10].mxu0 %vm389_vm0, %v373_v21 }
  0xaf   : > { %3123 = vmatprep.mubr.msk.f32.mxu0 %vm389_vm0, %v374_v22 }
  0xb2   : > { %3124 = vmatmul.mubr.msk.f32.gmra.mrb[12].mxu0 %vm389_vm0, %v375_v23 }
  0xb3   : > { %3126 = vmatprep.mubr.msk.f32.mxu0 %vm389_vm0, %v376_v24 }
  0xb6   : > { %3127 = vmatmul.mubr.msk.f32.gmra.mrb[14].mxu0 %vm389_vm0, %v377_v25 }
 0x16d   : > { %v3079_v28 = vpop.f32.mrb[0].mxu0 }
 0x16e   : > { %v3099_v29 = vpop.f32.mrb[0].mxu1  ;;  %v486_v30 = vadd.f32 %v3079_v28, %v2748_v26  ;;  %v480_v31 = vpop.f32.mrb[1].mxu0 }
 0x16f   : > { %v612_v32 = vadd.f32 %v3099_v29, %v2758_v27  ;;  %v606_v33 = vpop.f32.mrb[1].mxu1  ;;  %v481_v34 = vadd.f32 %v2748_v26, %v480_v31 }
 0x170   : > { %v607_v35 = vadd.f32 %v2758_v27, %v606_v33  ;;  %520 = vst.msk [vmem:[#allocation2 + $0x8] sm:$0xff] %vm389_vm0, %v486_v30 }
 0x171   : > { %647 = vst.msk [vmem:[#allocation2 + $0x48] sm:$0xff] %vm389_vm0, %v612_v32  ;;  %519 = vst.msk [vmem:[#allocation2] sm:$0xff] %vm389_vm0, %v481_v34  ;;  %v3082_v36 = vpop.f32.mrb[2].mxu0 }
 0x172   : > { %646 = vst.msk [vmem:[#allocation2 + $0x40] sm:$0xff] %vm389_vm0, %v607_v35  ;;  %v3102_v37 = vpop.f32.mrb[2].mxu1  ;;  %v496_v38 = vadd.f32 %v3082_v36, %v2748_v26  ;;  %v490_v39 = vpop.f32.mrb[3].mxu0 }
 0x173   : > { %v622_v40 = vadd.f32 %v3102_v37, %v2758_v27  ;;  %v616_v41 = vpop.f32.mrb[3].mxu1  ;;  %v491_v42 = vadd.f32 %v2748_v26, %v490_v39 }
 0x174   : > { %v617_v43 = vadd.f32 %v2758_v27, %v616_v41  ;;  %522 = vst.msk [vmem:[#allocation2 + $0x18] sm:$0xff] %vm389_vm0, %v496_v38 }
 0x175   : > { %649 = vst.msk [vmem:[#allocation2 + $0x58] sm:$0xff] %vm389_vm0, %v622_v40  ;;  %521 = vst.msk [vmem:[#allocation2 + $0x10] sm:$0xff] %vm389_vm0, %v491_v42  ;;  %v3085_v44 = vpop.f32.mrb[4].mxu0 }
 0x176   : > { %648 = vst.msk [vmem:[#allocation2 + $0x50] sm:$0xff] %vm389_vm0, %v617_v43  ;;  %v506_v45 = vadd.f32 %v3085_v44, %v2748_v26  ;;  %v500_v46 = vpop.f32.mrb[5].mxu0  ;;  %v3105_v47 = vpop.f32.mrb[4].mxu1 }
 0x177   : > { %v501_v48 = vadd.f32 %v2748_v26, %v500_v46  ;;  %v632_v49 = vadd.f32 %v3105_v47, %v2758_v27  ;;  %v626_v50 = vpop.f32.mrb[5].mxu1  ;;  %v782_v51 = vld [vmem:[#allocation2 + $0x8] sm:$0xff] }
 0x178   : > { %524 = vst.msk [vmem:[#allocation2 + $0x28] sm:$0xff] %vm389_vm0, %v506_v45  ;;  %v798_v53 = vld [vmem:[#allocation2 + $0x48] sm:$0xff]  ;;  %v627_v54 = vadd.f32 %v2758_v27, %v626_v50  ;;  %v781_v55 = vld [vmem:[#allocation2] sm:$0xff]  ;;  %v4323_v56 = vmul.f32 0.35355338, %v782_v51 }
 0x179   : > { %523 = vst.msk [vmem:[#allocation2 + $0x20] sm:$0xff] %vm389_vm0, %v501_v48  ;;  %v3088_v57 = vpop.f32.mrb[6].mxu0  ;;  %v797_v58 = vld [vmem:[#allocation2 + $0x40] sm:$0xff]  ;;  %651 = vst.msk [vmem:[#allocation2 + $0x68] sm:$0xff] %vm389_vm0, %v632_v49  ;;  %v4333_v60 = vmul.f32 0.35355338, %v781_v55 }
 0x17a   : > { %v516_v61 = vadd.f32 %v3088_v57, %v2748_v26  ;;  %v4335_v62 = vpack.c.bf16 %v798_v53, %v797_v58  ;;  %v510_v63 = vpop.f32.mrb[7].mxu0  ;;  %650 = vst.msk [vmem:[#allocation2 + $0x60] sm:$0xff] %vm389_vm0, %v627_v54  ;;  %v3108_v0 = vpop.f32.mrb[6].mxu1  ;;  %v4345_v2 = vmul.f32 %v4320_v52, %v4323_v56 }
 0x17b   : > { %v511_v3 = vadd.f32 %v2748_v26, %v510_v63  ;;  %v642_v5 = vadd.f32 %v3108_v0, %v2758_v27  ;;  %v636_v6 = vpop.f32.mrb[7].mxu1  ;;  %v828_v7 = vmul.f32 %v4341_v1, %v4333_v60  ;;  %v784_v8 = vld [vmem:[#allocation2 + $0x18] sm:$0xff]  ;;  %v4356_v9 = vmul.f32 %v4320_v52, %v4333_v60 }
 0x17c   : > { %526 = vst.msk [vmem:[#allocation2 + $0x38] sm:$0xff] %vm389_vm0, %v516_v61  ;;  %3399 = vmatprep.subr.msk.bf16.mxu1 %vm4328_vm1, %v4335_v62  ;;  %v800_v10 = vld [vmem:[#allocation2 + $0x58] sm:$0xff]  ;;  %v637_v11 = vadd.f32 %v2758_v27, %v636_v6  ;;  %v783_v12 = vld [vmem:[#allocation2 + $0x10] sm:$0xff]  ;;  %v4362_v13 = vmul.f32 0.35355338, %v784_v8 }
 0x17d   : > { %525 = vst.msk [vmem:[#allocation2 + $0x30] sm:$0xff] %vm389_vm0, %v511_v3  ;;  %3402 = vmatpush3.bf16.xpose.msk.msra.mxu1 %vm4328_vm1, %v4335_v62  ;;  %v3119_v14 = vpop.f32.mrb[8].mxu0  ;;  %v799_v15 = vld [vmem:[#allocation2 + $0x50] sm:$0xff]  ;;  %653 = vst.msk [vmem:[#allocation2 + $0x78] sm:$0xff] %vm389_vm0, %v642_v5  ;;  %3145 = vmatprep.mubr.msk.f32.mxu1 %vm389_vm0, %v828_v7  ;;  %v4370_v16 = vmul.f32 0.35355338, %v783_v12 }
 0x17e   : > { %v739_v17 = vadd.f32 %v3119_v14, %v4350_v4  ;;  %v733_v18 = vpop.f32.mrb[9].mxu0  ;;  %v4373_v19 = vpack.c.bf16 %v800_v10, %v799_v15  ;;  %652 = vst.msk [vmem:[#allocation2 + $0x70] sm:$0xff] %vm389_vm0, %v637_v11  ;;  %v4378_v20 = vmul.f32 %v4320_v52, %v4362_v13 }
 0x17f   : > { %v734_v21 = vadd.f32 %v4350_v4, %v733_v18  ;;  %v786_v22 = vld [vmem:[#allocation2 + $0x28] sm:$0xff]  ;;  %v4383_v23 = vmul.f32 %v4320_v52, %v4370_v16 }
 0x180   : > { %774 = vst.msk [vmem:[#allocation2 + $0x88] sm:$0xff] %vm389_vm0, %v739_v17  ;;  %3405 = vmatprep.subr.msk.bf16.mxu1 %vm4328_vm1, %v4373_v19  ;;  %v802_v24 = vld [vmem:[#allocation2 + $0x68] sm:$0xff]  ;;  %v785_v25 = vld [vmem:[#allocation2 + $0x20] sm:$0xff]  ;;  %v4389_v26 = vmul.f32 0.35355338, %v786_v22 }
 0x181   : > { %773 = vst.msk [vmem:[#allocation2 + $0x80] sm:$0xff] %vm389_vm0, %v734_v21  ;;  %v3122_v27 = vpop.f32.mrb[10].mxu0  ;;  %v801_v28 = vld [vmem:[#allocation2 + $0x60] sm:$0xff]  ;;  %v4392_v29 = vmul.f32 0.35355338, %v785_v25 }
 0x182   : > { %v749_v30 = vadd.f32 %v3122_v27, %v4350_v4  ;;  %v743_v31 = vpop.f32.mrb[11].mxu0  ;;  %v4395_v32 = vpack.c.bf16 %v802_v24, %v801_v28  ;;  %v4399_v33 = vmul.f32 %v4320_v52, %v4389_v26  ;;  %v830_v28 = vmul.f32 %v4341_v1, %v4370_v16 }
 0x183   : > { %v744_v34 = vadd.f32 %v4350_v4, %v743_v31  ;;  %v788_v35 = vld [vmem:[#allocation2 + $0x38] sm:$0xff]  ;;  %v4404_v36 = vmul.f32 %v4320_v52, %v4392_v29 }
 0x184   : > { %776 = vst.msk [vmem:[#allocation2 + $0x98] sm:$0xff] %vm389_vm0, %v749_v30  ;;  %v787_v37 = vld [vmem:[#allocation2 + $0x30] sm:$0xff]  ;;  %v4407_v38 = vmul.f32 0.35355338, %v788_v35  ;;  %v804_v47 = vld [vmem:[#allocation2 + $0x78] sm:$0xff]  ;;  %v829_v30 = vmul.f32 %v4341_v1, %v4323_v56 }
 0x185   : > { %775 = vst.msk [vmem:[#allocation2 + $0x90] sm:$0xff] %vm389_vm0, %v744_v34  ;;  %3408 = vmatpush3.bf16.xpose.msk.msra.mxu1 %vm4328_vm1, %v4373_v19  ;;  %v3125_v39 = vpop.f32.mrb[12].mxu0  ;;  %v4413_v40 = vmul.f32 0.35355338, %v787_v37  ;;  %v803_v46 = vld [vmem:[#allocation2 + $0x70] sm:$0xff]  ;;  %v831_v37 = vmul.f32 %v4341_v1, %v4362_v13 }
 0x186   : > { %v759_v41 = vadd.f32 %v3125_v39, %v4350_v4  ;;  %v753_v42 = vpop.f32.mrb[13].mxu0  ;;  %3411 = vmatprep.subr.msk.bf16.mxu1 %vm4328_vm1, %v4395_v32  ;;  %v4421_v43 = vmul.f32 %v4320_v52, %v4407_v38  ;;  %v4439_v57 = vpack.c.bf16 %v804_v47, %v803_v46  ;;  %v832_v39 = vmul.f32 %v4341_v1, %v4392_v29 }
 0x187   : > { %v754_v44 = vadd.f32 %v4350_v4, %v753_v42  ;;  %v4424_v45 = vld [vmem:[#allocation2 + $0x88] sm:$0xff]  ;;  %v4428_v48 = vmul.f32 %v4320_v52, %v4413_v40  ;;  %v833_v46 = vmul.f32 %v4341_v1, %v4389_v26  ;;  %v834_v47 = vmul.f32 %v4341_v1, %v4413_v40 }
 0x188   : > { %778 = vst.msk [vmem:[#allocation2 + $0xa8] sm:$0xff] %vm389_vm0, %v759_v41  ;;  %v4431_v49 = vld [vmem:[#allocation2 + $0x80] sm:$0xff]  ;;  %v1095_v50 = vmul.f32 %v4341_v1, %v4424_v45  ;;  %v1498_v6 = vmul.f32 %v4320_v52, %v4424_v45 }
 0x189   : > { %777 = vst.msk [vmem:[#allocation2 + $0xa0] sm:$0xff] %vm389_vm0, %v754_v44  ;;  %v3128_v51 = vpop.f32.mrb[14].mxu0  ;;  %v1094_v53 = vmul.f32 %v4341_v1, %v4431_v49  ;;  %v1497_v5 = vmul.f32 %v4320_v52, %v4431_v49 }
 0x18a   : > { %v769_v54 = vadd.f32 %v3128_v51, %v4350_v4  ;;  %v763_v55 = vpop.f32.mrb[15].mxu0  ;;  %v835_v51 = vmul.f32 %v4341_v1, %v4407_v38 }
 0x18b   : > { %v764_v58 = vadd.f32 %v4350_v4, %v763_v55  ;;  %v3421_v61 = vpack.c.bf16 %v1095_v50, %v1094_v53  ;;  %v4442_v63 = vld [vmem:[#allocation2 + $0x98] sm:$0xff]  ;;  %v3461_v14 = vpack.c.bf16 %v1498_v6, %v1497_v5 }
 0x18c   : > { %780 = vst.msk [vmem:[#allocation2 + $0xb8] sm:$0xff] %vm389_vm0, %v769_v54  ;;  %v4445_v0 = vld [vmem:[#allocation2 + $0x90] sm:$0xff]  ;;  %v1097_v3 = vmul.f32 %v4341_v1, %v4442_v63  ;;  %v1500_v25 = vmul.f32 %v4320_v52, %v4442_v63  ;;  %v837_v54 = vld [vmem:[#allocation8 + $0x8] sm:$0xff] }
 0x18d   : > { %779 = vst.msk [vmem:[#allocation2 + $0xb0] sm:$0xff] %vm389_vm0, %v764_v58  ;;  %3414 = vmatpush3.bf16.xpose.msk.msra.mxu1 %vm4328_vm1, %v4395_v32  ;;  %3422 = vmatprep.subr.bf16.mxu0 %v3421_v61  ;;  %v1096_v4 = vmul.f32 %v4341_v1, %v4445_v0  ;;  %v1499_v24 = vmul.f32 %v4320_v52, %v4445_v0 }
 0x18e   : > { %3424 = vmatpush3.bf16.msra.mxu0 %v3421_v61  ;;  %3417 = vmatprep.subr.msk.bf16.mxu1 %vm4328_vm1, %v4439_v57  ;;  %v839_v61 = vld [vmem:[#allocation8 + $0x18] sm:$0xff] }
 0x18f   : > { %v3425_v7 = vpack.c.bf16 %v1097_v3, %v1096_v4  ;;  %v4462_v8 = vld [vmem:[#allocation2 + $0xa8] sm:$0xff]  ;;  %v3465_v31 = vpack.c.bf16 %v1500_v25, %v1499_v24  ;;  %v838_v3 = vld [vmem:[#allocation8 + $0x10] sm:$0xff] }
 0x190   : > { %v4464_v10 = vld [vmem:[#allocation2 + $0xa0] sm:$0xff]  ;;  %v1099_v11 = vmul.f32 %v4341_v1, %v4462_v8  ;;  %v1502_v35 = vmul.f32 %v4320_v52, %v4462_v8 }
 0x191   : > { %3426 = vmatprep.subr.bf16.mxu0 %v3425_v7  ;;  %v1098_v12 = vmul.f32 %v4341_v1, %v4464_v10  ;;  %v1501_v34 = vmul.f32 %v4320_v52, %v4464_v10 }
 0x192   : > { %3428 = vmatpush3.bf16.msra.mxu0 %v3425_v7 }
 0x193   : > { %v3429_v15 = vpack.c.bf16 %v1099_v11, %v1098_v12  ;;  %v4470_v17 = vld [vmem:[#allocation2 + $0xb8] sm:$0xff]  ;;  %v3469_v41 = vpack.c.bf16 %v1502_v35, %v1501_v34  ;;  %v841_v12 = vld [vmem:[#allocation8 + $0x28] sm:$0xff] }
 0x194   : > { %v4472_v18 = vld [vmem:[#allocation2 + $0xb0] sm:$0xff]  ;;  %v1101_v21 = vmul.f32 %v4341_v1, %v4470_v17  ;;  %v1504_v44 = vmul.f32 %v4320_v52, %v4470_v17 }
 0x195   : > { %3420 = vmatpush3.bf16.xpose.msk.msra.mxu1 %vm4328_vm1, %v4439_v57  ;;  %3430 = vmatprep.subr.bf16.mxu0 %v3429_v15  ;;  %v1100_v22 = vmul.f32 %v4341_v1, %v4472_v18  ;;  %v1503_v42 = vmul.f32 %v4320_v52, %v4472_v18  ;;  %v836_v52 = vld [vmem:[#allocation8] sm:$0xff] }
 0x196   : > { %3432 = vmatpush3.bf16.msra.mxu0 %v3429_v15  ;;  %3462 = vmatprep.subr.bf16.mxu1 %v3461_v14 }
 0x197   : > { %v3433_v27 = vpack.c.bf16 %v1101_v21, %v1100_v22  ;;  %v3473_v50 = vpack.c.bf16 %v1504_v44, %v1503_v42 }
 0x199   : > { %3434 = vmatprep.subr.bf16.mxu0 %v3433_v27 }
 0x19a   : > { %3436 = vmatpush3.bf16.msra.mxu0 %v3433_v27 }
 0x19b   : > { %3439 = vmatprep.subr.msk.bf16.mxu0 %vm4328_vm1, %v4335_v62 }
 0x19c   : > { %3146 = vmatmul.mubr.msk.f32.vlgmr.msra.gmra.mrb[8].mxu1 %vm389_vm0, %v829_v30  ;;  %v843_v30 = vld [vmem:[#allocation8 + $0x38] sm:$0xff] }
 0x19d   : > { %3464 = vmatpush3.bf16.msra.mxu1 %v3461_v14  ;;  %3148 = vmatprep.mubr.msk.f32.mxu1 %vm389_vm0, %v830_v28  ;;  %v840_v14 = vld [vmem:[#allocation8 + $0x20] sm:$0xff] }
 0x19e   : > { %3466 = vmatprep.subr.bf16.mxu1 %v3465_v31 }
 0x1a0   : > { %3149 = vmatmul.mubr.msk.f32.gmra.mrb[10].mxu1 %vm389_vm0, %v831_v37 }
 0x1a1   : > { %3468 = vmatpush3.bf16.msra.mxu1 %v3465_v31  ;;  %3151 = vmatprep.mubr.msk.f32.mxu1 %vm389_vm0, %v832_v39  ;;  %v842_v31 = vld [vmem:[#allocation8 + $0x30] sm:$0xff] }
 0x1a2   : > { %3470 = vmatprep.subr.bf16.mxu1 %v3469_v41 }
 0x1a4   : > { %3152 = vmatmul.mubr.msk.f32.gmra.mrb[12].mxu1 %vm389_vm0, %v833_v46 }
 0x1a5   : > { %3472 = vmatpush3.bf16.msra.mxu1 %v3469_v41  ;;  %3154 = vmatprep.mubr.msk.f32.mxu1 %vm389_vm0, %v834_v47 }
 0x1a6   : > { %3474 = vmatprep.subr.bf16.mxu1 %v3473_v50 }
 0x1a8   : > { %3155 = vmatmul.mubr.msk.f32.gmra.mrb[14].mxu1 %vm389_vm0, %v835_v51 }
 0x1a9   : > { %3476 = vmatpush3.bf16.msra.mxu1 %v3473_v50 }
 0x1aa   : > { %3479 = vmatprep.subr.msk.bf16.mxu1 %vm4328_vm1, %v4335_v62 }
 0x26f   : > { %v3147_v53 = vpop.f32.mrb[8].mxu1 }
 0x270   : > { %v958_v55 = vpop.f32.mrb[9].mxu1  ;;  %v964_v1 = vadd.f32 %v3147_v53, %v837_v54 }
 0x271   : > { %v959_v58 = vadd.f32 %v958_v55, %v836_v52 }
 0x272   : > { %v1001_v22 = vsel %vm997_vm2, %v964_v1, -inf }
 0x273   : > { %v3150_v4 = vpop.f32.mrb[10].mxu1  ;;  %v998_v5 = vsel %vm997_vm2, %v959_v58, -inf }
 0x274   : > { %v968_v6 = vpop.f32.mrb[11].mxu1  ;;  %999 = vmax.xlane.f32.xlu0 %v998_v5  ;;  %v974_v7 = vadd.f32 %v3150_v4, %v839_v61 }
 0x275   : > { %v969_v11 = vadd.f32 %v968_v6, %v838_v3 }
 0x276   : > { %v1007_v28 = vsel %vm997_vm2, %v974_v7, -inf }
 0x277   : > { %v3153_v15 = vpop.f32.mrb[12].mxu1  ;;  %v1004_v21 = vsel %vm997_vm2, %v969_v11, -inf }
 0x278   : > { %v978_v24 = vpop.f32.mrb[13].mxu1  ;;  %1005 = vmax.xlane.f32.xlu1 %v1004_v21  ;;  %1002 = vmax.xlane.f32.xlu0 %v1001_v22  ;;  %v984_v25 = vadd.f32 %v3153_v15, %v841_v12 }
 0x279   : > { %v979_v27 = vadd.f32 %v978_v24, %v840_v14 }
 0x27a   : > { %v1013_v42 = vsel %vm997_vm2, %v984_v25, -inf }
 0x27b   : > { %v3156_v34 = vpop.f32.mrb[14].mxu1  ;;  %v1010_v35 = vsel %vm997_vm2, %v979_v27, -inf }
 0x27c   : > { %v988_v37 = vpop.f32.mrb[15].mxu1  ;;  %1008 = vmax.xlane.f32.xlu1 %v1007_v28  ;;  %1011 = vmax.xlane.f32.xlu0 %v1010_v35  ;;  %v994_v39 = vadd.f32 %v3156_v34, %v843_v30 }
 0x27d   : > { %v989_v41 = vadd.f32 %v988_v37, %v842_v31 }
 0x27e   : > { %v1019_v46 = vsel %vm997_vm2, %v994_v39, -inf }
 0x27f   : > { %v1016_v44 = vsel %vm997_vm2, %v989_v41, -inf }
 0x280   : > { %1014 = vmax.xlane.f32.xlu1 %v1013_v42  ;;  %1017 = vmax.xlane.f32.xlu0 %v1016_v44 }
 0x284   : > { %1020 = vmax.xlane.f32.xlu1 %v1019_v46 }
 0x301   : > { %v1000_v47 = vpop.xlane.xlu0 %999 }
 0x302   : > { %v1022_v50 = vsub.f32 %v959_v58, %v1000_v47 }
 0x304   : > { %v1030_v51 = vmul.f32 1.442695, %v1022_v50 }
 0x305   : > { %v1006_v52 = vpop.xlane.xlu1 %1005  ;;  %v1003_v53 = vpop.xlane.xlu0 %1002 }
 0x306   : > { %3671 = vpow2.f32 %v1030_v51  ;;  %v1024_v54 = vsub.f32 %v969_v11, %v1006_v52  ;;  %v1023_v55 = vsub.f32 %v964_v1, %v1003_v53 }
 0x308   : > { %v1034_v61 = vmul.f32 1.442695, %v1024_v54  ;;  %v1032_v3 = vmul.f32 1.442695, %v1023_v55  ;;  %v3996_v54 = vmov 0.0  }
 0x309   : > { %v1009_v4 = vpop.xlane.xlu1 %1008  ;;  %v1012_v5 = vpop.xlane.xlu0 %1011  ;;  %814 = vst.msk [vmem:[#allocation3 + $0x8] sm:$0xff] %vm389_vm0, %v3996_v54  ;;  %813 = vst.msk [vmem:[#allocation3] sm:$0xff] %vm389_vm0, %v3996_v54 }
 0x30a   : > { %3673 = vpow2.f32 %v1034_v61  ;;  %v1025_v6 = vsub.f32 %v974_v7, %v1009_v4  ;;  %v1026_v12 = vsub.f32 %v979_v27, %v1012_v5  ;;  %815 = vst.msk [vmem:[#allocation3 + $0x10] sm:$0xff] %vm389_vm0, %v3996_v54  ;;  %816 = vst.msk [vmem:[#allocation3 + $0x18] sm:$0xff] %vm389_vm0, %v3996_v54 }
 0x30b   : > { %3675 = vpow2.f32 %v1032_v3  ;;  %817 = vst.msk [vmem:[#allocation3 + $0x20] sm:$0xff] %vm389_vm0, %v3996_v54  ;;  %818 = vst.msk [vmem:[#allocation3 + $0x28] sm:$0xff] %vm389_vm0, %v3996_v54 }
 0x30c   : > { %v1036_v14 = vmul.f32 1.442695, %v1025_v6  ;;  %v1038_v15 = vmul.f32 1.442695, %v1026_v12  ;;  %819 = vst.msk [vmem:[#allocation3 + $0x30] sm:$0xff] %vm389_vm0, %v3996_v54  ;;  %820 = vst.msk [vmem:[#allocation3 + $0x38] sm:$0xff] %vm389_vm0, %v3996_v54 }
 0x30d   : > { %v1015_v21 = vpop.xlane.xlu1 %1014  ;;  %v1018_v22 = vpop.xlane.xlu0 %1017 }
 0x30e   : > { %3677 = vpow2.f32 %v1036_v14  ;;  %v1027_v58 = vsub.f32 %v984_v25, %v1015_v21  ;;  %v1028_v24 = vsub.f32 %v989_v41, %v1018_v22 }
 0x30f   : > { %3679 = vpow2.f32 %v1038_v15 }
 0x310   : > { %v3672_v28 = vpop.eup %3671  ;;  %v1040_v30 = vmul.f32 1.442695, %v1027_v58  ;;  %v1042_v11 = vmul.f32 1.442695, %v1028_v24 }
 0x311   : > { %v1021_v1 = vpop.xlane.xlu1 %1020  ;;  %v1046_v31 = vsel %vm997_vm2, %v3672_v28, 0.0 }
 0x312   : > { %3681 = vpow2.f32 %v1040_v30  ;;  %v1029_v34 = vsub.f32 %v994_v39, %v1021_v1  ;;  %1047 = vadd.xlane.f32.xlu0 %v1046_v31 }
 0x313   : > { %3683 = vpow2.f32 %v1042_v11 }
 0x314   : > { %v3674_v7 = vpop.eup %3673  ;;  %v1044_v27 = vmul.f32 1.442695, %v1029_v34 }
 0x315   : > { %v3676_v35 = vpop.eup %3675  ;;  %v1052_v37 = vsel %vm997_vm2, %v3674_v7, 0.0 }
 0x316   : > { %3685 = vpow2.f32 %v1044_v27  ;;  %1053 = vadd.xlane.f32.xlu0 %v1052_v37  ;;  %v1049_v25 = vsel %vm997_vm2, %v3676_v35, 0.0 }
 0x317   : > { %1050 = vadd.xlane.f32.xlu1 %v1049_v25 }
 0x318   : > { %v3678_v41 = vpop.eup %3677 }
 0x319   : > { %v3680_v42 = vpop.eup %3679  ;;  %v1055_v44 = vsel %vm997_vm2, %v3678_v41, 0.0 }
 0x31a   : > { %v1058_v46 = vsel %vm997_vm2, %v3680_v42, 0.0 }
 0x31b   : > { %1056 = vadd.xlane.f32.xlu1 %v1055_v44  ;;  %1059 = vadd.xlane.f32.xlu0 %v1058_v46 }
 0x31c   : > { %v3682_v39 = vpop.eup %3681 }
 0x31d   : > { %v3684_v47 = vpop.eup %3683  ;;  %v1061_v50 = vsel %vm997_vm2, %v3682_v39, 0.0 }
 0x31e   : > { %v1064_v51 = vsel %vm997_vm2, %v3684_v47, 0.0 }
 0x31f   : > { %1062 = vadd.xlane.f32.xlu1 %v1061_v50  ;;  %1065 = vadd.xlane.f32.xlu0 %v1064_v51 }
 0x320   : > { %v3686_v52 = vpop.eup %3685 }
 0x321   : > { %v1067_v53 = vsel %vm997_vm2, %v3686_v52, 0.0 }
 0x323   : > { %1068 = vadd.xlane.f32.xlu1 %v1067_v53 }
 0x39f   : > { %v1048_v55 = vpop.xlane.xlu0 %1047 }
 0x3a0   : > { %3687 = vrcp.f32 %v1048_v55 }
 0x3a3   : > { %v1054_v61 = vpop.xlane.xlu0 %1053 }
 0x3a4   : > { %v1051_v3 = vpop.xlane.xlu1 %1050  ;;  %3689 = vrcp.f32 %v1054_v61 }
 0x3a5   : > { %3691 = vrcp.f32 %v1051_v3  ;;  %v1089_v3 = vld [vmem:[#allocation3 + $0x18] sm:$0xff] }
 0x3a8   : > { %v1057_v4 = vpop.xlane.xlu1 %1056  ;;  %v1060_v5 = vpop.xlane.xlu0 %1059 }
 0x3a9   : > { %3693 = vrcp.f32 %v1057_v4 }
 0x3aa   : > { %v3688_v6 = vpop.eup %3687  ;;  %3695 = vrcp.f32 %v1060_v5 }
 0x3ab   : > { %v1078_v12 = vmul.f32 %v3688_v6, %v3672_v28 }
 0x3ac   : > { %v1063_v14 = vpop.xlane.xlu1 %1062  ;;  %v1066_v15 = vpop.xlane.xlu0 %1065 }
 0x3ad   : > { %3697 = vrcp.f32 %v1063_v14  ;;  %3173 = vmatprep.mubr.msk.f32.mxu0 %vm997_vm2, %v1078_v12  ;;  %v1091_v12 = vld [vmem:[#allocation3 + $0x28] sm:$0xff]  ;;  %v1090_v14 = vld [vmem:[#allocation3 + $0x20] sm:$0xff] }
 0x3ae   : > { %v3690_v21 = vpop.eup %3689  ;;  %3699 = vrcp.f32 %v1066_v15 }
 0x3af   : > { %v3692_v22 = vpop.eup %3691  ;;  %v1080_v58 = vmul.f32 %v3690_v21, %v3674_v7 }
 0x3b0   : > { %v1079_v24 = vmul.f32 %v3692_v22, %v3676_v35  ;;  %v1069_v30 = vpop.xlane.xlu1 %1068 }
 0x3b1   : > { %3701 = vrcp.f32 %v1069_v30  ;;  %v1092_v30 = vld [vmem:[#allocation3 + $0x30] sm:$0xff] }
 0x3b2   : > { %3174 = vmatmul.mubr.msk.f32.vlgmr.msra.gmra.mrb[16].mxu0 %vm997_vm2, %v1079_v24  ;;  %v1093_v24 = vld [vmem:[#allocation3 + $0x38] sm:$0xff] }
 0x3b3   : > { %v3694_v11 = vpop.eup %3693  ;;  %3442 = vmatpush3.bf16.xpose.msk.msra.mxu0 %vm4328_vm1, %v4335_v62  ;;  %3176 = vmatprep.mubr.msk.f32.mxu0 %vm997_vm2, %v1080_v58 }
 0x3b4   : > { %v3696_v28 = vpop.eup %3695  ;;  %3445 = vmatprep.subr.msk.bf16.mxu0 %vm4328_vm1, %v4373_v19  ;;  %v1081_v1 = vmul.f32 %v3694_v11, %v3678_v41  ;;  %v4575_v41 = vld [vmem:[%s4880_s4 + $0x2] ss:$0 sm:$0xff] }
 0x3b5   : > { %v1082_v31 = vmul.f32 %v3696_v28, %v3680_v42  ;;  %v1900_v42 = vmul.f32 %v4575_v41, %v4431_v49  ;;  %v1901_v44 = vmul.f32 %v4575_v41, %v4424_v45  ;;  %v1902_v46 = vmul.f32 %v4575_v41, %v4445_v0 }
 0x3b6   : > { %3177 = vmatmul.mubr.msk.f32.gmra.mrb[18].mxu0 %vm997_vm2, %v1081_v1  ;;  %v1904_v50 = vmul.f32 %v4575_v41, %v4464_v10  ;;  %v1905_v51 = vmul.f32 %v4575_v41, %v4462_v8  ;;  %v1906_v53 = vmul.f32 %v4575_v41, %v4472_v18 }
 0x3b7   : > { %v3698_v34 = vpop.eup %3697  ;;  %3179 = vmatprep.mubr.msk.f32.mxu0 %vm997_vm2, %v1082_v31 }
 0x3b8   : > { %v3700_v7 = vpop.eup %3699  ;;  %v1083_v27 = vmul.f32 %v3698_v34, %v3682_v39  ;;  %v1903_v39 = vmul.f32 %v4575_v41, %v4442_v63  ;;  %v1265_v34 = vld [vmem:[#allocation8 + $0x48] sm:$0xff] }
 0x3b9   : > { %v1084_v35 = vmul.f32 %v3700_v7, %v3684_v47  ;;  %v1264_v7 = vld [vmem:[#allocation8 + $0x40] sm:$0xff] }
 0x3ba   : > { %3180 = vmatmul.mubr.msk.f32.gmra.mrb[20].mxu0 %vm997_vm2, %v1083_v27  ;;  %v3505_v47 = vpack.c.bf16 %v1903_v39, %v1902_v46 }
 0x3bb   : > { %v3702_v37 = vpop.eup %3701  ;;  %3448 = vmatpush3.bf16.xpose.msk.msra.mxu0 %vm4328_vm1, %v4373_v19  ;;  %3182 = vmatprep.mubr.msk.f32.mxu0 %vm997_vm2, %v1084_v35 }
 0x3bc   : > { %3451 = vmatprep.subr.msk.bf16.mxu0 %vm4328_vm1, %v4395_v32  ;;  %v1085_v25 = vmul.f32 %v3702_v37, %v3686_v52  ;;  %v3509_v52 = vpack.c.bf16 %v1905_v51, %v1904_v50 }
 0x3be   : > { %3183 = vmatmul.mubr.msk.f32.gmra.mrb[22].mxu0 %vm997_vm2, %v1085_v25 }
 0x3bf   : > { %3201 = vmatprep.mubr.msk.f32.mxu0 %vm389_vm0, %v4356_v9  ;;  %v3501_v9 = vpack.c.bf16 %v1901_v44, %v1900_v42  ;;  %v1267_v42 = vld [vmem:[#allocation8 + $0x58] sm:$0xff] }
 0x3c3   : > { %3454 = vmatpush3.bf16.xpose.msk.msra.mxu0 %vm4328_vm1, %v4395_v32 }
 0x3c4   : > { %3457 = vmatprep.subr.msk.bf16.mxu0 %vm4328_vm1, %v4439_v57 }
 0x3cb   : > { %3460 = vmatpush3.bf16.xpose.msk.msra.mxu0 %vm4328_vm1, %v4439_v57 }
 0x3cc   : > { %3502 = vmatprep.subr.bf16.mxu0 %v3501_v9 }
 0x3d2   : > { %3202 = vmatmul.mubr.msk.f32.vlgmr.msra.gmra.mrb[24].mxu0 %vm389_vm0, %v4345_v2  ;;  %v1907_v2 = vmul.f32 %v4575_v41, %v4470_v17 }
 0x3d3   : > { %3204 = vmatprep.mubr.msk.f32.mxu0 %vm389_vm0, %v4383_v23  ;;  %3504 = vmatpush3.bf16.msra.mxu0 %v3501_v9  ;;  %v1266_v9 = vld [vmem:[#allocation8 + $0x50] sm:$0xff] }
 0x3d4   : > { %3506 = vmatprep.subr.bf16.mxu0 %v3505_v47  ;;  %v3513_v23 = vpack.c.bf16 %v1907_v2, %v1906_v53  ;;  %v1268_v2 = vld [vmem:[#allocation8 + $0x60] sm:$0xff] }
 0x3d6   : > { %3205 = vmatmul.mubr.msk.f32.gmra.mrb[26].mxu0 %vm389_vm0, %v4378_v20  ;;  %v1087_v20 = vld [vmem:[#allocation3 + $0x8] sm:$0xff] }
 0x3d7   : > { %3207 = vmatprep.mubr.msk.f32.mxu0 %vm389_vm0, %v4404_v36  ;;  %3508 = vmatpush3.bf16.msra.mxu0 %v3505_v47  ;;  %v1086_v36 = vld [vmem:[#allocation3] sm:$0xff] }
 0x3d8   : > { %3510 = vmatprep.subr.bf16.mxu0 %v3509_v52 }
 0x3da   : > { %3208 = vmatmul.mubr.msk.f32.gmra.mrb[28].mxu0 %vm389_vm0, %v4399_v33 }
 0x3db   : > { %3210 = vmatprep.mubr.msk.f32.mxu0 %vm389_vm0, %v4428_v48  ;;  %3512 = vmatpush3.bf16.msra.mxu0 %v3509_v52  ;;  %v1088_v48 = vld [vmem:[#allocation3 + $0x10] sm:$0xff]  ;;  %v1269_v52 = vld [vmem:[#allocation8 + $0x68] sm:$0xff] }
 0x3dc   : > { %3514 = vmatprep.subr.bf16.mxu0 %v3513_v23 }
 0x3de   : > { %3211 = vmatmul.mubr.msk.f32.gmra.mrb[30].mxu0 %vm389_vm0, %v4421_v43 }
 0x3df   : > { %3516 = vmatpush3.bf16.msra.mxu0 %v3513_v23 }
 0x3e0   : > { %3519 = vmatprep.subr.msk.bf16.mxu0 %vm4328_vm1, %v4335_v62 }
 0x485   : > { %v3175_v54 = vpop.f32.mrb[16].mxu0 }
 0x486   : > { %v1232_v55 = vadd.f32 %v3175_v54, %v1087_v20  ;;  %v1192_v61 = vpop.f32.mrb[17].mxu0 }
 0x487   : > { %v1231_v33 = vadd.f32 %v1192_v61, %v1086_v36  ;;  %v1271_v61 = vld [vmem:[#allocation8 + $0x78] sm:$0xff] }
 0x488   : > { %1240 = vst.msk [vmem:[#allocation3 + $0x8] sm:$0xff] %vm389_vm0, %v1232_v55 }
 0x489   : > { %1239 = vst.msk [vmem:[#allocation3] sm:$0xff] %vm389_vm0, %v1231_v33  ;;  %v3178_v4 = vpop.f32.mrb[18].mxu0 }
 0x48a   : > { %v1234_v5 = vadd.f32 %v3178_v4, %v1089_v3  ;;  %v1202_v43 = vpop.f32.mrb[19].mxu0  ;;  %v1270_v3 = vld [vmem:[#allocation8 + $0x70] sm:$0xff] }
 0x48b   : > { %v1233_v6 = vadd.f32 %v1202_v43, %v1088_v48 }
 0x48c   : > { %1242 = vst.msk [vmem:[#allocation3 + $0x18] sm:$0xff] %vm389_vm0, %v1234_v5 }
 0x48d   : > { %1241 = vst.msk [vmem:[#allocation3 + $0x10] sm:$0xff] %vm389_vm0, %v1233_v6  ;;  %v3181_v15 = vpop.f32.mrb[20].mxu0 }
 0x48e   : > { %v1236_v21 = vadd.f32 %v3181_v15, %v1091_v12  ;;  %v1212_v22 = vpop.f32.mrb[21].mxu0 }
 0x48f   : > { %v1235_v58 = vadd.f32 %v1212_v22, %v1090_v14 }
 0x490   : > { %1244 = vst.msk [vmem:[#allocation3 + $0x28] sm:$0xff] %vm389_vm0, %v1236_v21 }
 0x491   : > { %1243 = vst.msk [vmem:[#allocation3 + $0x20] sm:$0xff] %vm389_vm0, %v1235_v58  ;;  %v3184_v11 = vpop.f32.mrb[22].mxu0 }
 0x492   : > { %v1238_v28 = vadd.f32 %v3184_v11, %v1093_v24  ;;  %v1222_v1 = vpop.f32.mrb[23].mxu0 }
 0x493   : > { %v1237_v31 = vadd.f32 %v1222_v1, %v1092_v30 }
 0x494   : > { %1246 = vst.msk [vmem:[#allocation3 + $0x38] sm:$0xff] %vm389_vm0, %v1238_v28 }
 0x495   : > { %1245 = vst.msk [vmem:[#allocation3 + $0x30] sm:$0xff] %vm389_vm0, %v1237_v31 }
 0x4a5   : > { %v3203_v27 = vpop.f32.mrb[24].mxu0 }
 0x4a6   : > { %v1368_v35 = vadd.f32 %v3203_v27, %v1265_v34  ;;  %v1362_v37 = vpop.f32.mrb[25].mxu0 }
 0x4a7   : > { %v1363_v25 = vadd.f32 %v1362_v37, %v1264_v7 }
 0x4a8   : > { %v1404_v44 = vsel %vm997_vm2, %v1368_v35, -inf }
 0x4a9   : > { %1405 = vmax.xlane.f32.xlu1 %v1404_v44  ;;  %v3206_v46 = vpop.f32.mrb[26].mxu0  ;;  %v1401_v39 = vsel %vm997_vm2, %v1363_v25, -inf }
 0x4aa   : > { %v1378_v47 = vadd.f32 %v3206_v46, %v1267_v42  ;;  %v1372_v50 = vpop.f32.mrb[27].mxu0  ;;  %1402 = vmax.xlane.f32.xlu0 %v1401_v39 }
 0x4ab   : > { %v1373_v51 = vadd.f32 %v1372_v50, %v1266_v9 }
 0x4ac   : > { %v1410_v53 = vsel %vm997_vm2, %v1378_v47, -inf }
 0x4ad   : > { %1411 = vmax.xlane.f32.xlu1 %v1410_v53  ;;  %v3209_v23 = vpop.f32.mrb[28].mxu0  ;;  %v1407_v20 = vsel %vm997_vm2, %v1373_v51, -inf }
 0x4ae   : > { %v1388_v36 = vadd.f32 %v3209_v23, %v1269_v52  ;;  %v1382_v54 = vpop.f32.mrb[29].mxu0  ;;  %1408 = vmax.xlane.f32.xlu0 %v1407_v20 }
 0x4af   : > { %v1383_v55 = vadd.f32 %v1382_v54, %v1268_v2 }
 0x4b0   : > { %v1416_v33 = vsel %vm997_vm2, %v1388_v36, -inf }
 0x4b1   : > { %1417 = vmax.xlane.f32.xlu1 %v1416_v33  ;;  %v3212_v48 = vpop.f32.mrb[30].mxu0  ;;  %v1413_v4 = vsel %vm997_vm2, %v1383_v55, -inf }
 0x4b2   : > { %v1398_v5 = vadd.f32 %v3212_v48, %v1271_v61  ;;  %v1392_v43 = vpop.f32.mrb[31].mxu0  ;;  %1414 = vmax.xlane.f32.xlu0 %v1413_v4 }
 0x4b3   : > { %v1393_v6 = vadd.f32 %v1392_v43, %v1270_v3 }
 0x4b4   : > { %v1422_v12 = vsel %vm997_vm2, %v1398_v5, -inf }
 0x4b5   : > { %1423 = vmax.xlane.f32.xlu1 %v1422_v12  ;;  %v1419_v14 = vsel %vm997_vm2, %v1393_v6, -inf }
 0x4b6   : > { %1420 = vmax.xlane.f32.xlu0 %v1419_v14 }
 0x536   : > { %v1406_v15 = vpop.xlane.xlu1 %1405 }
 0x537   : > { %v1426_v21 = vsub.f32 %v1368_v35, %v1406_v15  ;;  %v1403_v22 = vpop.xlane.xlu0 %1402 }
 0x538   : > { %v1425_v58 = vsub.f32 %v1363_v25, %v1403_v22 }
 0x539   : > { %v1435_v24 = vmul.f32 1.442695, %v1426_v21 }
 0x53a   : > { %v1433_v30 = vmul.f32 1.442695, %v1425_v58  ;;  %v1412_v11 = vpop.xlane.xlu1 %1411 }
 0x53b   : > { %3703 = vpow2.f32 %v1435_v24  ;;  %v1428_v28 = vsub.f32 %v1378_v47, %v1412_v11  ;;  %v1409_v1 = vpop.xlane.xlu0 %1408 }
 0x53c   : > { %3705 = vpow2.f32 %v1433_v30  ;;  %v1427_v31 = vsub.f32 %v1373_v51, %v1409_v1 }
 0x53d   : > { %v1439_v34 = vmul.f32 1.442695, %v1428_v28 }
 0x53e   : > { %v1437_v7 = vmul.f32 1.442695, %v1427_v31  ;;  %v1418_v27 = vpop.xlane.xlu1 %1417 }
 0x53f   : > { %3707 = vpow2.f32 %v1439_v34  ;;  %v1430_v37 = vsub.f32 %v1388_v36, %v1418_v27  ;;  %v1415_v42 = vpop.xlane.xlu0 %1414 }
 0x540   : > { %3709 = vpow2.f32 %v1437_v7  ;;  %v1429_v44 = vsub.f32 %v1383_v55, %v1415_v42 }
 0x541   : > { %v1443_v9 = vmul.f32 1.442695, %v1430_v37 }
 0x542   : > { %v1441_v35 = vmul.f32 1.442695, %v1429_v44  ;;  %v1424_v46 = vpop.xlane.xlu1 %1423 }
 0x543   : > { %3711 = vpow2.f32 %v1443_v9  ;;  %v1432_v25 = vsub.f32 %v1398_v5, %v1424_v46  ;;  %v1421_v39 = vpop.xlane.xlu0 %1420 }
 0x544   : > { %3713 = vpow2.f32 %v1441_v35  ;;  %v1431_v50 = vsub.f32 %v1393_v6, %v1421_v39 }
 0x545   : > { %v3704_v47 = vpop.eup %3703  ;;  %v1447_v52 = vmul.f32 1.442695, %v1432_v25 }
 0x546   : > { %v3706_v53 = vpop.eup %3705  ;;  %v1445_v51 = vmul.f32 1.442695, %v1431_v50  ;;  %v1452_v2 = vsel %vm997_vm2, %v3704_v47, 0.0 }
 0x547   : > { %3715 = vpow2.f32 %v1447_v52  ;;  %1453 = vadd.xlane.f32.xlu1 %v1452_v2  ;;  %v1449_v23 = vsel %vm997_vm2, %v3706_v53, 0.0  ;;  %v4669_v52 = vld [vmem:[%s4880_s4 + $0x3] ss:$0 sm:$0xff] }
 0x548   : > { %3717 = vpow2.f32 %v1445_v51  ;;  %1450 = vadd.xlane.f32.xlu0 %v1449_v23  ;;  %v2304_v51 = vmul.f32 %v4669_v52, %v4424_v45  ;;  %v2305_v23 = vmul.f32 %v4669_v52, %v4445_v0  ;;  %v1662_v0 = vmul.f32 %v4575_v41, %v4392_v29 }
 0x549   : > { %v3708_v20 = vpop.eup %3707  ;;  %v2067_v59 = vmul.f32 %v4669_v52, %v4413_v40 }
 0x54a   : > { %v3710_v36 = vpop.eup %3709  ;;  %v1458_v54 = vsel %vm997_vm2, %v3708_v20, 0.0 }
 0x54b   : > { %1459 = vadd.xlane.f32.xlu1 %v1458_v54  ;;  %v1455_v55 = vsel %vm997_vm2, %v3710_v36, 0.0  ;;  %v2307_v54 = vmul.f32 %v4669_v52, %v4464_v10  ;;  %v2310_v10 = vmul.f32 %v4669_v52, %v4470_v17  ;;  %v1665_v17 = vmul.f32 %v4575_v41, %v4407_v38 }
 0x54c   : > { %1456 = vadd.xlane.f32.xlu0 %v1455_v55  ;;  %v2308_v55 = vmul.f32 %v4669_v52, %v4462_v8  ;;  %v1663_v8 = vmul.f32 %v4575_v41, %v4389_v26 }
 0x54d   : > { %v3712_v61 = vpop.eup %3711 }
 0x54e   : > { %v3714_v33 = vpop.eup %3713  ;;  %v1464_v3 = vsel %vm997_vm2, %v3712_v61, 0.0 }
 0x54f   : > { %1465 = vadd.xlane.f32.xlu1 %v1464_v3  ;;  %v1461_v48 = vsel %vm997_vm2, %v3714_v33, 0.0  ;;  %v1664_v3 = vmul.f32 %v4575_v41, %v4413_v40 }
 0x550   : > { %1462 = vadd.xlane.f32.xlu0 %v1461_v48 }
 0x551   : > { %v3716_v4 = vpop.eup %3715 }
 0x552   : > { %v3718_v5 = vpop.eup %3717  ;;  %v1470_v43 = vsel %vm997_vm2, %v3716_v4, 0.0 }
 0x553   : > { %1471 = vadd.xlane.f32.xlu1 %v1470_v43  ;;  %v1467_v6 = vsel %vm997_vm2, %v3718_v5, 0.0  ;;  %v1489_v43 = vld [vmem:[#allocation3] sm:$0xff] }
 0x554   : > { %1468 = vadd.xlane.f32.xlu0 %v1467_v6 }
 0x5d4   : > { %v1454_v12 = vpop.xlane.xlu1 %1453 }
 0x5d5   : > { %3719 = vrcp.f32 %v1454_v12  ;;  %v1451_v14 = vpop.xlane.xlu0 %1450 }
 0x5d6   : > { %3721 = vrcp.f32 %v1451_v14  ;;  %v1492_v14 = vld [vmem:[#allocation3 + $0x18] sm:$0xff] }
 0x5d8   : > { %v1460_v15 = vpop.xlane.xlu1 %1459 }
 0x5d9   : > { %3723 = vrcp.f32 %v1460_v15  ;;  %v1457_v21 = vpop.xlane.xlu0 %1456 }
 0x5da   : > { %3725 = vrcp.f32 %v1457_v21 }
 0x5dc   : > { %v1466_v22 = vpop.xlane.xlu1 %1465 }
 0x5dd   : > { %3727 = vrcp.f32 %v1466_v22  ;;  %v1463_v58 = vpop.xlane.xlu0 %1462  ;;  %v1491_v22 = vld [vmem:[#allocation3 + $0x10] sm:$0xff] }
 0x5de   : > { %3729 = vrcp.f32 %v1463_v58 }
 0x5df   : > { %v3720_v24 = vpop.eup %3719 }
 0x5e0   : > { %v3722_v30 = vpop.eup %3721  ;;  %v1472_v11 = vpop.xlane.xlu1 %1471  ;;  %v1482_v31 = vmul.f32 %v3720_v24, %v3704_v47  ;;  %v1658_v47 = vmul.f32 %v4575_v41, %v4333_v60 }
 0x5e1   : > { %3731 = vrcp.f32 %v1472_v11  ;;  %v1469_v28 = vpop.xlane.xlu0 %1468  ;;  %v1481_v1 = vmul.f32 %v3722_v30, %v3706_v53  ;;  %v2303_v53 = vmul.f32 %v4669_v52, %v4431_v49  ;;  %v1660_v49 = vmul.f32 %v4575_v41, %v4370_v16 }
 0x5e2   : > { %3733 = vrcp.f32 %v1469_v28  ;;  %v1493_v28 = vld [vmem:[#allocation3 + $0x20] sm:$0xff] }
 0x5e3   : > { %v3724_v34 = vpop.eup %3723  ;;  %3229 = vmatprep.mubr.msk.f32.mxu1 %vm997_vm2, %v1481_v1  ;;  %v3541_v2 = vpack.c.bf16 %v2304_v51, %v2303_v53  ;;  %v1669_v51 = vld [vmem:[#allocation8 + $0x90] sm:$0xff] }
 0x5e4   : > { %v3726_v7 = vpop.eup %3725  ;;  %3230 = vmatmul.mubr.msk.f32.vlgmr.msra.gmra.mrb[16].mxu1 %vm997_vm2, %v1482_v31  ;;  %v1484_v37 = vmul.f32 %v3724_v34, %v3708_v20  ;;  %v2306_v20 = vmul.f32 %v4669_v52, %v4442_v63  ;;  %v1661_v63 = vmul.f32 %v4575_v41, %v4362_v13  ;;  %v1496_v34 = vld [vmem:[#allocation3 + $0x38] sm:$0xff] }
 0x5e5   : > { %3482 = vmatpush3.bf16.xpose.msk.msra.mxu1 %vm4328_vm1, %v4335_v62  ;;  %v1483_v27 = vmul.f32 %v3726_v7, %v3710_v36  ;;  %v1659_v36 = vmul.f32 %v4575_v41, %v4323_v56  ;;  %v1494_v41 = vld [vmem:[#allocation3 + $0x28] sm:$0xff] }
 0x5e6   : > { %3485 = vmatprep.subr.msk.bf16.mxu1 %vm4328_vm1, %v4373_v19  ;;  %v3545_v45 = vpack.c.bf16 %v2306_v20, %v2305_v23 }
 0x5e7   : > { %v3728_v42 = vpop.eup %3727  ;;  %3232 = vmatprep.mubr.msk.f32.mxu1 %vm997_vm2, %v1483_v27 }
 0x5e8   : > { %v3730_v44 = vpop.eup %3729  ;;  %3233 = vmatmul.mubr.msk.f32.gmra.mrb[18].mxu1 %vm997_vm2, %v1484_v37  ;;  %v1486_v35 = vmul.f32 %v3728_v42, %v3712_v61  ;;  %v3549_v61 = vpack.c.bf16 %v2308_v55, %v2307_v54  ;;  %v1495_v37 = vld [vmem:[#allocation3 + $0x30] sm:$0xff]  ;;  %v1671_v55 = vld [vmem:[#allocation8 + $0xa0] sm:$0xff] }
 0x5e9   : > { %v1485_v9 = vmul.f32 %v3730_v44, %v3714_v33  ;;  %v2309_v33 = vmul.f32 %v4669_v52, %v4472_v18  ;;  %v1490_v18 = vld [vmem:[#allocation3 + $0x8] sm:$0xff] }
 0x5eb   : > { %v3732_v46 = vpop.eup %3731  ;;  %3235 = vmatprep.mubr.msk.f32.mxu1 %vm997_vm2, %v1485_v9  ;;  %v3553_v48 = vpack.c.bf16 %v2310_v10, %v2309_v33  ;;  %v1668_v9 = vld [vmem:[#allocation8 + $0x88] sm:$0xff] }
 0x5ec   : > { %v3734_v25 = vpop.eup %3733  ;;  %3236 = vmatmul.mubr.msk.f32.gmra.mrb[20].mxu1 %vm997_vm2, %v1486_v35  ;;  %v1488_v50 = vmul.f32 %v3732_v46, %v3716_v4  ;;  %v1667_v35 = vld [vmem:[#allocation8 + $0x80] sm:$0xff] }
 0x5ed   : > { %3488 = vmatpush3.bf16.xpose.msk.msra.mxu1 %vm4328_vm1, %v4373_v19  ;;  %v1487_v39 = vmul.f32 %v3734_v25, %v3718_v5 }
 0x5ee   : > { %3491 = vmatprep.subr.msk.bf16.mxu1 %vm4328_vm1, %v4395_v32 }
 0x5ef   : > { %3238 = vmatprep.mubr.msk.f32.mxu1 %vm997_vm2, %v1487_v39 }
 0x5f0   : > { %3239 = vmatmul.mubr.msk.f32.gmra.mrb[22].mxu1 %vm997_vm2, %v1488_v50 }
 0x5f1   : > { %3257 = vmatprep.mubr.msk.f32.mxu1 %vm389_vm0, %v1658_v47  ;;  %v1670_v47 = vld [vmem:[#allocation8 + $0x98] sm:$0xff] }
 0x5f5   : > { %3494 = vmatpush3.bf16.xpose.msk.msra.mxu1 %vm4328_vm1, %v4395_v32 }
 0x5f6   : > { %3497 = vmatprep.subr.msk.bf16.mxu1 %vm4328_vm1, %v4439_v57 }
 0x5fd   : > { %3500 = vmatpush3.bf16.xpose.msk.msra.mxu1 %vm4328_vm1, %v4439_v57 }
 0x5fe   : > { %3542 = vmatprep.subr.bf16.mxu1 %v3541_v2 }
 0x604   : > { %3258 = vmatmul.mubr.msk.f32.vlgmr.msra.gmra.mrb[24].mxu1 %vm389_vm0, %v1659_v36 }
 0x605   : > { %3260 = vmatprep.mubr.msk.f32.mxu1 %vm389_vm0, %v1660_v49  ;;  %3544 = vmatpush3.bf16.msra.mxu1 %v3541_v2 }
 0x606   : > { %3546 = vmatprep.subr.bf16.mxu1 %v3545_v45 }
 0x608   : > { %3261 = vmatmul.mubr.msk.f32.gmra.mrb[26].mxu1 %vm389_vm0, %v1661_v63 }
 0x609   : > { %3263 = vmatprep.mubr.msk.f32.mxu1 %vm389_vm0, %v1662_v0  ;;  %3548 = vmatpush3.bf16.msra.mxu1 %v3545_v45  ;;  %v1672_v45 = vld [vmem:[#allocation8 + $0xa8] sm:$0xff] }
 0x60a   : > { %3550 = vmatprep.subr.bf16.mxu1 %v3549_v61 }
 0x60c   : > { %3264 = vmatmul.mubr.msk.f32.gmra.mrb[28].mxu1 %vm389_vm0, %v1663_v8  ;;  %v1674_v8 = vld [vmem:[#allocation8 + $0xb8] sm:$0xff] }
 0x60d   : > { %3266 = vmatprep.mubr.msk.f32.mxu1 %vm389_vm0, %v1664_v3  ;;  %3552 = vmatpush3.bf16.msra.mxu1 %v3549_v61 }
 0x60e   : > { %3554 = vmatprep.subr.bf16.mxu1 %v3553_v48 }
 0x610   : > { %3267 = vmatmul.mubr.msk.f32.gmra.mrb[30].mxu1 %vm389_vm0, %v1665_v17 }
 0x611   : > { %3556 = vmatpush3.bf16.msra.mxu1 %v3553_v48  ;;  %v1673_v48 = vld [vmem:[#allocation8 + $0xb0] sm:$0xff] }
 0x6b7   : > { %v3231_v4 = vpop.f32.mrb[16].mxu1 }
 0x6b8   : > { %v1635_v5 = vadd.f32 %v3231_v4, %v1490_v18  ;;  %v1595_v6 = vpop.f32.mrb[17].mxu1 }
 0x6b9   : > { %v1634_v12 = vadd.f32 %v1595_v6, %v1489_v43 }
 0x6ba   : > { %1643 = vst.msk [vmem:[#allocation3 + $0x8] sm:$0xff] %vm389_vm0, %v1635_v5 }
 0x6bb   : > { %1642 = vst.msk [vmem:[#allocation3] sm:$0xff] %vm389_vm0, %v1634_v12  ;;  %v3234_v15 = vpop.f32.mrb[18].mxu1 }
 0x6bc   : > { %v1637_v21 = vadd.f32 %v3234_v15, %v1492_v14  ;;  %v1605_v58 = vpop.f32.mrb[19].mxu1 }
 0x6bd   : > { %v1636_v24 = vadd.f32 %v1605_v58, %v1491_v22 }
 0x6be   : > { %1645 = vst.msk [vmem:[#allocation3 + $0x18] sm:$0xff] %vm389_vm0, %v1637_v21 }
 0x6bf   : > { %1644 = vst.msk [vmem:[#allocation3 + $0x10] sm:$0xff] %vm389_vm0, %v1636_v24  ;;  %v3237_v30 = vpop.f32.mrb[20].mxu1 }
 0x6c0   : > { %v1639_v11 = vadd.f32 %v3237_v30, %v1494_v41  ;;  %v1615_v1 = vpop.f32.mrb[21].mxu1 }
 0x6c1   : > { %v1638_v31 = vadd.f32 %v1615_v1, %v1493_v28 }
 0x6c2   : > { %1647 = vst.msk [vmem:[#allocation3 + $0x28] sm:$0xff] %vm389_vm0, %v1639_v11 }
 0x6c3   : > { %1646 = vst.msk [vmem:[#allocation3 + $0x20] sm:$0xff] %vm389_vm0, %v1638_v31  ;;  %v3240_v7 = vpop.f32.mrb[22].mxu1 }
 0x6c4   : > { %v1641_v27 = vadd.f32 %v3240_v7, %v1496_v34  ;;  %v1625_v42 = vpop.f32.mrb[23].mxu1 }
 0x6c5   : > { %v1640_v44 = vadd.f32 %v1625_v42, %v1495_v37 }
 0x6c6   : > { %1649 = vst.msk [vmem:[#allocation3 + $0x38] sm:$0xff] %vm389_vm0, %v1641_v27 }
 0x6c7   : > { %1648 = vst.msk [vmem:[#allocation3 + $0x30] sm:$0xff] %vm389_vm0, %v1640_v44 }
 0x6d7   : > { %v3259_v46 = vpop.f32.mrb[24].mxu1 }
 0x6d8   : > { %v1771_v25 = vadd.f32 %v3259_v46, %v1668_v9  ;;  %v1765_v39 = vpop.f32.mrb[25].mxu1 }
 0x6d9   : > { %v1766_v50 = vadd.f32 %v1765_v39, %v1667_v35 }
 0x6da   : > { %v1807_v53 = vsel %vm997_vm2, %v1771_v25, -inf }
 0x6db   : > { %1808 = vmax.xlane.f32.xlu1 %v1807_v53  ;;  %v3262_v2 = vpop.f32.mrb[26].mxu1  ;;  %v1804_v23 = vsel %vm997_vm2, %v1766_v50, -inf }
 0x6dc   : > { %v1781_v20 = vadd.f32 %v3262_v2, %v1670_v47  ;;  %v1775_v36 = vpop.f32.mrb[27].mxu1  ;;  %1805 = vmax.xlane.f32.xlu0 %v1804_v23 }
 0x6dd   : > { %v1776_v49 = vadd.f32 %v1775_v36, %v1669_v51 }
 0x6de   : > { %v1813_v54 = vsel %vm997_vm2, %v1781_v20, -inf }
 0x6df   : > { %1814 = vmax.xlane.f32.xlu1 %v1813_v54  ;;  %v3265_v63 = vpop.f32.mrb[28].mxu1  ;;  %v1810_v0 = vsel %vm997_vm2, %v1776_v49, -inf }
 0x6e0   : > { %v1791_v61 = vadd.f32 %v3265_v63, %v1672_v45  ;;  %v1785_v33 = vpop.f32.mrb[29].mxu1  ;;  %1811 = vmax.xlane.f32.xlu0 %v1810_v0 }
 0x6e1   : > { %v1786_v10 = vadd.f32 %v1785_v33, %v1671_v55 }
 0x6e2   : > { %v1819_v3 = vsel %vm997_vm2, %v1791_v61, -inf }
 0x6e3   : > { %1820 = vmax.xlane.f32.xlu1 %v1819_v3  ;;  %v3268_v17 = vpop.f32.mrb[30].mxu1  ;;  %v1816_v18 = vsel %vm997_vm2, %v1786_v10, -inf }
 0x6e4   : > { %v1801_v4 = vadd.f32 %v3268_v17, %v1674_v8  ;;  %v1795_v5 = vpop.f32.mrb[31].mxu1  ;;  %1817 = vmax.xlane.f32.xlu0 %v1816_v18 }
 0x6e5   : > { %v1796_v43 = vadd.f32 %v1795_v5, %v1673_v48 }
 0x6e6   : > { %v1825_v6 = vsel %vm997_vm2, %v1801_v4, -inf }
 0x6e7   : > { %1826 = vmax.xlane.f32.xlu1 %v1825_v6  ;;  %v1822_v12 = vsel %vm997_vm2, %v1796_v43, -inf }
 0x6e8   : > { %1823 = vmax.xlane.f32.xlu0 %v1822_v12 }
 0x768   : > { %v1809_v14 = vpop.xlane.xlu1 %1808 }
 0x769   : > { %v1829_v15 = vsub.f32 %v1771_v25, %v1809_v14  ;;  %v1806_v21 = vpop.xlane.xlu0 %1805 }
 0x76a   : > { %v1828_v22 = vsub.f32 %v1766_v50, %v1806_v21 }
 0x76b   : > { %v1838_v58 = vmul.f32 1.442695, %v1829_v15 }
 0x76c   : > { %v1836_v24 = vmul.f32 1.442695, %v1828_v22  ;;  %v1815_v41 = vpop.xlane.xlu1 %1814 }
 0x76d   : > { %3735 = vpow2.f32 %v1838_v58  ;;  %v1831_v30 = vsub.f32 %v1781_v20, %v1815_v41  ;;  %v1812_v11 = vpop.xlane.xlu0 %1811 }
 0x76e   : > { %3737 = vpow2.f32 %v1836_v24  ;;  %v1830_v28 = vsub.f32 %v1776_v49, %v1812_v11 }
 0x76f   : > { %v1842_v1 = vmul.f32 1.442695, %v1831_v30 }
 0x770   : > { %v1840_v31 = vmul.f32 1.442695, %v1830_v28  ;;  %v1821_v34 = vpop.xlane.xlu1 %1820 }
 0x771   : > { %3739 = vpow2.f32 %v1842_v1  ;;  %v1833_v7 = vsub.f32 %v1791_v61, %v1821_v34  ;;  %v1818_v27 = vpop.xlane.xlu0 %1817 }
 0x772   : > { %3741 = vpow2.f32 %v1840_v31  ;;  %v1832_v37 = vsub.f32 %v1786_v10, %v1818_v27  ;;  %v2065_v27 = vmul.f32 %v4669_v52, %v4392_v29 }
 0x773   : > { %v1846_v42 = vmul.f32 1.442695, %v1833_v7  ;;  %v2061_v7 = vmul.f32 %v4669_v52, %v4333_v60  ;;  %v2063_v60 = vmul.f32 %v4669_v52, %v4370_v16  ;;  %v1893_v16 = vld [vmem:[#allocation3 + $0x8] sm:$0xff] }
 0x774   : > { %v1844_v44 = vmul.f32 1.442695, %v1832_v37  ;;  %v1827_v9 = vpop.xlane.xlu1 %1826  ;;  %v1892_v37 = vld [vmem:[#allocation3] sm:$0xff] }
 0x775   : > { %3743 = vpow2.f32 %v1846_v42  ;;  %v1835_v35 = vsub.f32 %v1801_v4, %v1827_v9  ;;  %v1824_v46 = vpop.xlane.xlu0 %1823 }
 0x776   : > { %3745 = vpow2.f32 %v1844_v44  ;;  %v1834_v25 = vsub.f32 %v1796_v43, %v1824_v46 }
 0x777   : > { %v3736_v39 = vpop.eup %3735  ;;  %v1850_v50 = vmul.f32 1.442695, %v1835_v35  ;;  %v1894_v35 = vld [vmem:[#allocation3 + $0x10] sm:$0xff] }
 0x778   : > { %v3738_v47 = vpop.eup %3737  ;;  %v1848_v53 = vmul.f32 1.442695, %v1834_v25  ;;  %v1855_v51 = vsel %vm997_vm2, %v3736_v39, 0.0 }
 0x779   : > { %3747 = vpow2.f32 %v1850_v50  ;;  %1856 = vadd.xlane.f32.xlu1 %v1855_v51  ;;  %v1852_v2 = vsel %vm997_vm2, %v3738_v47, 0.0  ;;  %v1896_v50 = vld [vmem:[#allocation3 + $0x20] sm:$0xff]  ;;  %v1899_v51 = vld [vmem:[#allocation3 + $0x38] sm:$0xff] }
 0x77a   : > { %3749 = vpow2.f32 %v1848_v53  ;;  %1853 = vadd.xlane.f32.xlu0 %v1852_v2 }
 0x77b   : > { %v3740_v23 = vpop.eup %3739 }
 0x77c   : > { %v3742_v20 = vpop.eup %3741  ;;  %v1861_v36 = vsel %vm997_vm2, %v3740_v23, 0.0 }
 0x77d   : > { %1862 = vadd.xlane.f32.xlu1 %v1861_v36  ;;  %v1858_v49 = vsel %vm997_vm2, %v3742_v20, 0.0 }
 0x77e   : > { %1859 = vadd.xlane.f32.xlu0 %v1858_v49 }
 0x77f   : > { %v3744_v45 = vpop.eup %3743 }
 0x780   : > { %v3746_v54 = vpop.eup %3745  ;;  %v1867_v55 = vsel %vm997_vm2, %v3744_v45, 0.0 }
 0x781   : > { %1868 = vadd.xlane.f32.xlu1 %v1867_v55  ;;  %v1864_v63 = vsel %vm997_vm2, %v3746_v54, 0.0 }
 0x782   : > { %1865 = vadd.xlane.f32.xlu0 %v1864_v63 }
 0x783   : > { %v3748_v0 = vpop.eup %3747 }
 0x784   : > { %v3750_v61 = vpop.eup %3749  ;;  %v1873_v33 = vsel %vm997_vm2, %v3748_v0, 0.0 }
 0x785   : > { %1874 = vadd.xlane.f32.xlu1 %v1873_v33  ;;  %v1870_v10 = vsel %vm997_vm2, %v3750_v61, 0.0  ;;  %v2073_v33 = vld [vmem:[#allocation8 + $0xd8] sm:$0xff] }
 0x786   : > { %1871 = vadd.xlane.f32.xlu0 %v1870_v10 }
 0x806   : > { %v1857_v8 = vpop.xlane.xlu1 %1856 }
 0x807   : > { %3751 = vrcp.f32 %v1857_v8  ;;  %v1854_v3 = vpop.xlane.xlu0 %1853  ;;  %v2072_v8 = vld [vmem:[#allocation8 + $0xd0] sm:$0xff] }
 0x808   : > { %3753 = vrcp.f32 %v1854_v3 }
 0x80a   : > { %v1863_v48 = vpop.xlane.xlu1 %1862 }
 0x80b   : > { %3755 = vrcp.f32 %v1863_v48  ;;  %v1860_v17 = vpop.xlane.xlu0 %1859 }
 0x80c   : > { %3757 = vrcp.f32 %v1860_v17 }
 0x80e   : > { %v1869_v18 = vpop.xlane.xlu1 %1868 }
 0x80f   : > { %3759 = vrcp.f32 %v1869_v18  ;;  %v1866_v4 = vpop.xlane.xlu0 %1865 }
 0x810   : > { %3761 = vrcp.f32 %v1866_v4 }
 0x811   : > { %v3752_v5 = vpop.eup %3751 }
 0x812   : > { %v3754_v43 = vpop.eup %3753  ;;  %v1875_v6 = vpop.xlane.xlu1 %1874  ;;  %v1885_v15 = vmul.f32 %v3752_v5, %v3736_v39  ;;  %v2075_v5 = vld [vmem:[#allocation8 + $0xe8] sm:$0xff] }
 0x813   : > { %3763 = vrcp.f32 %v1875_v6  ;;  %v1872_v12 = vpop.xlane.xlu0 %1871  ;;  %v1884_v14 = vmul.f32 %v3754_v43, %v3738_v47  ;;  %v2074_v6 = vld [vmem:[#allocation8 + $0xe0] sm:$0xff] }
 0x814   : > { %3765 = vrcp.f32 %v1872_v12 }
 0x815   : > { %v3756_v21 = vpop.eup %3755  ;;  %3285 = vmatprep.mubr.msk.f32.mxu0 %vm997_vm2, %v1884_v14 }
 0x816   : > { %v3758_v22 = vpop.eup %3757  ;;  %3286 = vmatmul.mubr.msk.f32.vlgmr.msra.gmra.mrb[32].mxu0 %vm997_vm2, %v1885_v15  ;;  %v1887_v24 = vmul.f32 %v3756_v21, %v3740_v23 }
 0x817   : > { %3522 = vmatpush3.bf16.xpose.msk.msra.mxu0 %vm4328_vm1, %v4335_v62  ;;  %v1886_v58 = vmul.f32 %v3758_v22, %v3742_v20  ;;  %v1898_v20 = vld [vmem:[#allocation3 + $0x30] sm:$0xff] }
 0x818   : > { %3525 = vmatprep.subr.msk.bf16.mxu0 %vm4328_vm1, %v4373_v19 }
 0x819   : > { %v3760_v41 = vpop.eup %3759  ;;  %3288 = vmatprep.mubr.msk.f32.mxu0 %vm997_vm2, %v1886_v58  ;;  %v2077_v58 = vld [vmem:[#allocation8 + $0xf8] sm:$0xff] }
 0x81a   : > { %v3762_v30 = vpop.eup %3761  ;;  %3289 = vmatmul.mubr.msk.f32.gmra.mrb[34].mxu0 %vm997_vm2, %v1887_v24  ;;  %v1889_v28 = vmul.f32 %v3760_v41, %v3744_v45  ;;  %v2071_v45 = vld [vmem:[#allocation8 + $0xc8] sm:$0xff]  ;;  %v2076_v41 = vld [vmem:[#allocation8 + $0xf0] sm:$0xff] }
 0x81b   : > { %v1888_v11 = vmul.f32 %v3762_v30, %v3746_v54  ;;  %v2070_v54 = vld [vmem:[#allocation8 + $0xc0] sm:$0xff] }
 0x81d   : > { %v3764_v1 = vpop.eup %3763  ;;  %3291 = vmatprep.mubr.msk.f32.mxu0 %vm997_vm2, %v1888_v11 }
 0x81e   : > { %v3766_v31 = vpop.eup %3765  ;;  %3292 = vmatmul.mubr.msk.f32.gmra.mrb[36].mxu0 %vm997_vm2, %v1889_v28  ;;  %v1891_v34 = vmul.f32 %v3764_v1, %v3748_v0 }
 0x81f   : > { %3528 = vmatpush3.bf16.xpose.msk.msra.mxu0 %vm4328_vm1, %v4373_v19  ;;  %v1890_v62 = vmul.f32 %v3766_v31, %v3750_v61  ;;  %v2062_v19 = vmul.f32 %v4669_v52, %v4323_v56  ;;  %v2066_v56 = vmul.f32 %v4669_v52, %v4389_v26  ;;  %v1895_v26 = vld [vmem:[#allocation3 + $0x18] sm:$0xff] }
 0x820   : > { %3531 = vmatprep.subr.msk.bf16.mxu0 %vm4328_vm1, %v4395_v32 }
 0x821   : > { %3294 = vmatprep.mubr.msk.f32.mxu0 %vm997_vm2, %v1890_v62 }
 0x822   : > { %3295 = vmatmul.mubr.msk.f32.gmra.mrb[38].mxu0 %vm997_vm2, %v1891_v34 }
 0x823   : > { %3313 = vmatprep.mubr.msk.f32.mxu0 %vm389_vm0, %v2061_v7 }
 0x827   : > { %3534 = vmatpush3.bf16.xpose.msk.msra.mxu0 %vm4328_vm1, %v4395_v32  ;;  %v2064_v32 = vmul.f32 %v4669_v52, %v4362_v13  ;;  %v2068_v13 = vmul.f32 %v4669_v52, %v4407_v38  ;;  %v1897_v38 = vld [vmem:[#allocation3 + $0x28] sm:$0xff] }
 0x828   : > { %3537 = vmatprep.subr.msk.bf16.mxu0 %vm4328_vm1, %v4439_v57 }
 0x82f   : > { %3540 = vmatpush3.bf16.xpose.msk.msra.mxu0 %vm4328_vm1, %v4439_v57 }
 0x836   : > { %3314 = vmatmul.mubr.msk.f32.vlgmr.msra.gmra.mrb[40].mxu0 %vm389_vm0, %v2062_v19 }
 0x837   : > { %3316 = vmatprep.mubr.msk.f32.mxu0 %vm389_vm0, %v2063_v60 }
 0x83a   : > { %3317 = vmatmul.mubr.msk.f32.gmra.mrb[42].mxu0 %vm389_vm0, %v2064_v32 }
 0x83b   : > { %3319 = vmatprep.mubr.msk.f32.mxu0 %vm389_vm0, %v2065_v27 }
 0x83e   : > { %3320 = vmatmul.mubr.msk.f32.gmra.mrb[44].mxu0 %vm389_vm0, %v2066_v56 }
 0x83f   : > { %3322 = vmatprep.mubr.msk.f32.mxu0 %vm389_vm0, %v2067_v59 }
 0x842   : > { %3323 = vmatmul.mubr.msk.f32.gmra.mrb[46].mxu0 %vm389_vm0, %v2068_v13 }
 0x8e9   : > { %v3287_v29 = vpop.f32.mrb[32].mxu0 }
 0x8ea   : > { %v2038_v57 = vadd.f32 %v3287_v29, %v1893_v16  ;;  %v1998_v42 = vpop.f32.mrb[33].mxu0 }
 0x8eb   : > { %v2037_v44 = vadd.f32 %v1998_v42, %v1892_v37 }
 0x8ec   : > { %2046 = vst.msk [vmem:[#allocation3 + $0x8] sm:$0xff] %vm389_vm0, %v2038_v57 }
 0x8ed   : > { %2045 = vst.msk [vmem:[#allocation3] sm:$0xff] %vm389_vm0, %v2037_v44  ;;  %v3290_v40 = vpop.f32.mrb[34].mxu0 }
 0x8ee   : > { %v2040_v9 = vadd.f32 %v3290_v40, %v1895_v26  ;;  %v2008_v46 = vpop.f32.mrb[35].mxu0 }
 0x8ef   : > { %v2039_v25 = vadd.f32 %v2008_v46, %v1894_v35 }
 0x8f0   : > { %2048 = vst.msk [vmem:[#allocation3 + $0x18] sm:$0xff] %vm389_vm0, %v2040_v9 }
 0x8f1   : > { %2047 = vst.msk [vmem:[#allocation3 + $0x10] sm:$0xff] %vm389_vm0, %v2039_v25  ;;  %v3293_v52 = vpop.f32.mrb[36].mxu0 }
 0x8f2   : > { %v2042_v39 = vadd.f32 %v3293_v52, %v1897_v38  ;;  %v2018_v47 = vpop.f32.mrb[37].mxu0 }
 0x8f3   : > { %v2041_v53 = vadd.f32 %v2018_v47, %v1896_v50 }
 0x8f4   : > { %2050 = vst.msk [vmem:[#allocation3 + $0x28] sm:$0xff] %vm389_vm0, %v2042_v39 }
 0x8f5   : > { %2049 = vst.msk [vmem:[#allocation3 + $0x20] sm:$0xff] %vm389_vm0, %v2041_v53  ;;  %v3296_v2 = vpop.f32.mrb[38].mxu0 }
 0x8f6   : > { %v2044_v23 = vadd.f32 %v3296_v2, %v1899_v51  ;;  %v2028_v36 = vpop.f32.mrb[39].mxu0 }
 0x8f7   : > { %v2043_v49 = vadd.f32 %v2028_v36, %v1898_v20 }
 0x8f8   : > { %2052 = vst.msk [vmem:[#allocation3 + $0x38] sm:$0xff] %vm389_vm0, %v2044_v23 }
 0x8f9   : > { %2051 = vst.msk [vmem:[#allocation3 + $0x30] sm:$0xff] %vm389_vm0, %v2043_v49 }
 0x909   : > { %v3315_v55 = vpop.f32.mrb[40].mxu0 }
 0x90a   : > { %v2174_v63 = vadd.f32 %v3315_v55, %v2071_v45  ;;  %v2168_v0 = vpop.f32.mrb[41].mxu0 }
 0x90b   : > { %v2169_v61 = vadd.f32 %v2168_v0, %v2070_v54 }
 0x90c   : > { %v2210_v10 = vsel %vm997_vm2, %v2174_v63, -inf }
 0x90d   : > { %2211 = vmax.xlane.f32.xlu1 %v2210_v10  ;;  %v3318_v3 = vpop.f32.mrb[42].mxu0  ;;  %v2207_v48 = vsel %vm997_vm2, %v2169_v61, -inf }
 0x90e   : > { %v2184_v17 = vadd.f32 %v3318_v3, %v2073_v33  ;;  %v2178_v18 = vpop.f32.mrb[43].mxu0  ;;  %2208 = vmax.xlane.f32.xlu0 %v2207_v48  ;;  %v2465_v3 = vld [vmem:[#allocation9 + $0x8] sm:$0xff] }
 0x90f   : > { %v2179_v4 = vadd.f32 %v2178_v18, %v2072_v8  ;;  %v2464_v8 = vld [vmem:[#allocation9] sm:$0xff] }
 0x910   : > { %v2216_v43 = vsel %vm997_vm2, %v2184_v17, -inf  ;;  %v3557_v48 = vpack.c.bf16 %v2465_v3, %v2464_v8 }
 0x911   : > { %2217 = vmax.xlane.f32.xlu1 %v2216_v43  ;;  %v3321_v12 = vpop.f32.mrb[44].mxu0  ;;  %v2213_v14 = vsel %vm997_vm2, %v2179_v4, -inf }
 0x912   : > { %v2194_v15 = vadd.f32 %v3321_v12, %v2075_v5  ;;  %v2188_v21 = vpop.f32.mrb[45].mxu0  ;;  %2214 = vmax.xlane.f32.xlu0 %v2213_v14  ;;  %3558 = vmatprep.subr.bf16.mxu1 %v3557_v48 }
 0x913   : > { %v2189_v22 = vadd.f32 %v2188_v21, %v2074_v6 }
 0x914   : > { %v2222_v24 = vsel %vm997_vm2, %v2194_v15, -inf }
 0x915   : > { %2223 = vmax.xlane.f32.xlu1 %v2222_v24  ;;  %v3324_v30 = vpop.f32.mrb[46].mxu0  ;;  %v2219_v11 = vsel %vm997_vm2, %v2189_v22, -inf }
 0x916   : > { %v2204_v28 = vadd.f32 %v3324_v30, %v2077_v58  ;;  %v2198_v1 = vpop.f32.mrb[47].mxu0  ;;  %2220 = vmax.xlane.f32.xlu0 %v2219_v11 }
 0x917   : > { %v2199_v31 = vadd.f32 %v2198_v1, %v2076_v41 }
 0x918   : > { %v2228_v62 = vsel %vm997_vm2, %v2204_v28, -inf }
 0x919   : > { %2229 = vmax.xlane.f32.xlu1 %v2228_v62  ;;  %v2225_v34 = vsel %vm997_vm2, %v2199_v31, -inf }
 0x91a   : > { %2226 = vmax.xlane.f32.xlu0 %v2225_v34 }
 0x99a   : > { %v2212_v7 = vpop.xlane.xlu1 %2211 }
 0x99b   : > { %v2232_v19 = vsub.f32 %v2174_v63, %v2212_v7  ;;  %v2209_v60 = vpop.xlane.xlu0 %2208 }
 0x99c   : > { %v2231_v32 = vsub.f32 %v2169_v61, %v2209_v60 }
 0x99d   : > { %v2241_v27 = vmul.f32 1.442695, %v2232_v19 }
 0x99e   : > { %v2239_v56 = vmul.f32 1.442695, %v2231_v32  ;;  %v2218_v59 = vpop.xlane.xlu1 %2217  ;;  %v2466_v32 = vld [vmem:[#allocation9 + $0x10] sm:$0xff] }
 0x99f   : > { %3767 = vpow2.f32 %v2241_v27  ;;  %v2234_v13 = vsub.f32 %v2184_v17, %v2218_v59  ;;  %v2215_v16 = vpop.xlane.xlu0 %2214  ;;  %v2467_v27 = vld [vmem:[#allocation9 + $0x18] sm:$0xff]  ;;  %v2296_v59 = vld [vmem:[#allocation3 + $0x8] sm:$0xff] }
 0x9a0   : > { %3769 = vpow2.f32 %v2239_v56  ;;  %v2233_v29 = vsub.f32 %v2179_v4, %v2215_v16  ;;  %v3561_v56 = vpack.c.bf16 %v2467_v27, %v2466_v32 }
 0x9a1   : > { %v2245_v57 = vmul.f32 1.442695, %v2234_v13 }
 0x9a2   : > { %v2243_v37 = vmul.f32 1.442695, %v2233_v29  ;;  %v2224_v42 = vpop.xlane.xlu1 %2223  ;;  %v2295_v29 = vld [vmem:[#allocation3] sm:$0xff] }
 0x9a3   : > { %3771 = vpow2.f32 %v2245_v57  ;;  %v2236_v44 = vsub.f32 %v2194_v15, %v2224_v42  ;;  %v2221_v26 = vpop.xlane.xlu0 %2220  ;;  %v2298_v42 = vld [vmem:[#allocation3 + $0x18] sm:$0xff] }
 0x9a4   : > { %3773 = vpow2.f32 %v2243_v37  ;;  %v2235_v40 = vsub.f32 %v2189_v22, %v2221_v26 }
 0x9a5   : > { %v2249_v9 = vmul.f32 1.442695, %v2236_v44 }
 0x9a6   : > { %v2247_v35 = vmul.f32 1.442695, %v2235_v40  ;;  %v2230_v46 = vpop.xlane.xlu1 %2229  ;;  %v2297_v40 = vld [vmem:[#allocation3 + $0x10] sm:$0xff] }
 0x9a7   : > { %3775 = vpow2.f32 %v2249_v9  ;;  %v2238_v25 = vsub.f32 %v2204_v28, %v2230_v46  ;;  %v2227_v38 = vpop.xlane.xlu0 %2226  ;;  %v2300_v46 = vld [vmem:[#allocation3 + $0x28] sm:$0xff] }
 0x9a8   : > { %3777 = vpow2.f32 %v2247_v35  ;;  %v2237_v52 = vsub.f32 %v2199_v31, %v2227_v38 }
 0x9a9   : > { %v3768_v39 = vpop.eup %3767  ;;  %v2253_v50 = vmul.f32 1.442695, %v2238_v25 }
 0x9aa   : > { %v3770_v47 = vpop.eup %3769  ;;  %v2251_v53 = vmul.f32 1.442695, %v2237_v52  ;;  %v2258_v51 = vsel %vm997_vm2, %v3768_v39, 0.0  ;;  %v2299_v52 = vld [vmem:[#allocation3 + $0x20] sm:$0xff] }
 0x9ab   : > { %3779 = vpow2.f32 %v2253_v50  ;;  %2259 = vadd.xlane.f32.xlu1 %v2258_v51  ;;  %v2255_v2 = vsel %vm997_vm2, %v3770_v47, 0.0 }
 0x9ac   : > { %3781 = vpow2.f32 %v2251_v53  ;;  %2256 = vadd.xlane.f32.xlu0 %v2255_v2  ;;  %v2302_v53 = vld [vmem:[#allocation3 + $0x38] sm:$0xff] }
 0x9ad   : > { %v3772_v23 = vpop.eup %3771 }
 0x9ae   : > { %v3774_v20 = vpop.eup %3773  ;;  %v2264_v36 = vsel %vm997_vm2, %v3772_v23, 0.0 }
 0x9af   : > { %2265 = vadd.xlane.f32.xlu1 %v2264_v36  ;;  %v2261_v49 = vsel %vm997_vm2, %v3774_v20, 0.0 }
 0x9b0   : > { %2262 = vadd.xlane.f32.xlu0 %v2261_v49 }
 0x9b1   : > { %v3776_v45 = vpop.eup %3775 }
 0x9b2   : > { %v3778_v54 = vpop.eup %3777  ;;  %v2270_v55 = vsel %vm997_vm2, %v3776_v45, 0.0 }
 0x9b3   : > { %2271 = vadd.xlane.f32.xlu1 %v2270_v55  ;;  %v2267_v63 = vsel %vm997_vm2, %v3778_v54, 0.0 }
 0x9b4   : > { %2268 = vadd.xlane.f32.xlu0 %v2267_v63 }
 0x9b5   : > { %v3780_v0 = vpop.eup %3779 }
 0x9b6   : > { %v3782_v61 = vpop.eup %3781  ;;  %v2276_v33 = vsel %vm997_vm2, %v3780_v0, 0.0 }
 0x9b7   : > { %2277 = vadd.xlane.f32.xlu1 %v2276_v33  ;;  %v2273_v10 = vsel %vm997_vm2, %v3782_v61, 0.0  ;;  %v2880_v33 = vld [vmem:[%s4910_s13] ss:$0 sm:$0xff] }
 0x9b8   : > { %2274 = vadd.xlane.f32.xlu0 %v2273_v10 }
 0xa38   : > { %v2260_v17 = vpop.xlane.xlu1 %2259 }
 0xa39   : > { %3783 = vrcp.f32 %v2260_v17  ;;  %v2257_v18 = vpop.xlane.xlu0 %2256 }
 0xa3a   : > { %3785 = vrcp.f32 %v2257_v18 }
 0xa3c   : > { %v2266_v4 = vpop.xlane.xlu1 %2265 }
 0xa3d   : > { %3787 = vrcp.f32 %v2266_v4  ;;  %v2263_v5 = vpop.xlane.xlu0 %2262 }
 0xa3e   : > { %3789 = vrcp.f32 %v2263_v5 }
 0xa40   : > { %v2272_v43 = vpop.xlane.xlu1 %2271 }
 0xa41   : > { %3791 = vrcp.f32 %v2272_v43  ;;  %v2269_v6 = vpop.xlane.xlu0 %2268 }
 0xa42   : > { %3793 = vrcp.f32 %v2269_v6 }
 0xa43   : > { %v3784_v12 = vpop.eup %3783 }
 0xa44   : > { %v3786_v14 = vpop.eup %3785  ;;  %v2278_v15 = vpop.xlane.xlu1 %2277  ;;  %v2288_v58 = vmul.f32 %v3784_v12, %v3768_v39 }
 0xa45   : > { %3795 = vrcp.f32 %v2278_v15  ;;  %v2275_v21 = vpop.xlane.xlu0 %2274  ;;  %v2287_v22 = vmul.f32 %v3786_v14, %v3770_v47 }
 0xa46   : > { %3797 = vrcp.f32 %v2275_v21 }
 0xa47   : > { %v3788_v24 = vpop.eup %3787  ;;  %3341 = vmatprep.mubr.msk.f32.mxu1 %vm997_vm2, %v2287_v22 }
 0xa48   : > { %v3790_v41 = vpop.eup %3789  ;;  %3342 = vmatmul.mubr.msk.f32.vlgmr.msra.gmra.mrb[32].mxu1 %vm997_vm2, %v2288_v58  ;;  %v2290_v11 = vmul.f32 %v3788_v24, %v3772_v23 }
 0xa49   : > { %v2289_v30 = vmul.f32 %v3790_v41, %v3774_v20  ;;  %3560 = vmatpush3.bf16.msra.mxu1 %v3557_v48  ;;  %v2301_v20 = vld [vmem:[#allocation3 + $0x30] sm:$0xff] }
 0xa4a   : > { %3562 = vmatprep.subr.bf16.mxu1 %v3561_v56 }
 0xa4b   : > { %v3792_v28 = vpop.eup %3791  ;;  %3344 = vmatprep.mubr.msk.f32.mxu1 %vm997_vm2, %v2289_v30 }
 0xa4c   : > { %v3794_v1 = vpop.eup %3793  ;;  %3345 = vmatmul.mubr.msk.f32.gmra.mrb[34].mxu1 %vm997_vm2, %v2290_v11  ;;  %v2292_v62 = vmul.f32 %v3792_v28, %v3776_v45 }
 0xa4d   : > { %v2291_v31 = vmul.f32 %v3794_v1, %v3778_v54  ;;  %3564 = vmatpush3.bf16.msra.mxu1 %v3561_v56 }
 0xa4f   : > { %v3796_v34 = vpop.eup %3795  ;;  %3347 = vmatprep.mubr.msk.f32.mxu1 %vm997_vm2, %v2291_v31 }
 0xa50   : > { %v3798_v7 = vpop.eup %3797  ;;  %3348 = vmatmul.mubr.msk.f32.gmra.mrb[36].mxu1 %vm997_vm2, %v2292_v62  ;;  %v2294_v60 = vmul.f32 %v3796_v34, %v3780_v0 }
 0xa51   : > { %v2293_v19 = vmul.f32 %v3798_v7, %v3782_v61 }
 0xa53   : > { %3350 = vmatprep.mubr.msk.f32.mxu1 %vm997_vm2, %v2293_v19 }
 0xa54   : > { %3351 = vmatmul.mubr.msk.f32.gmra.mrb[38].mxu1 %vm997_vm2, %v2294_v60 }
 0xb1b   : > { %v3343_v13 = vpop.f32.mrb[32].mxu1 }
 0xb1c   : > { %v2441_v16 = vadd.f32 %v3343_v13, %v2296_v59  ;;  %v2401_v57 = vpop.f32.mrb[33].mxu1 }
 0xb1d   : > { %v2440_v37 = vadd.f32 %v2401_v57, %v2295_v29 }
 0xb1e   : > { %2449 = vst.msk [vmem:[#allocation3 + $0x8] sm:$0xff] %vm389_vm0, %v2441_v16 }
 0xb1f   : > { %2448 = vst.msk [vmem:[#allocation3] sm:$0xff] %vm389_vm0, %v2440_v37  ;;  %v3346_v44 = vpop.f32.mrb[34].mxu1 }
 0xb20   : > { %v2443_v26 = vadd.f32 %v3346_v44, %v2298_v42  ;;  %v2411_v9 = vpop.f32.mrb[35].mxu1 }
 0xb21   : > { %v2442_v35 = vadd.f32 %v2411_v9, %v2297_v40 }
 0xb22   : > { %2451 = vst.msk [vmem:[#allocation3 + $0x18] sm:$0xff] %vm389_vm0, %v2443_v26 }
 0xb23   : > { %2450 = vst.msk [vmem:[#allocation3 + $0x10] sm:$0xff] %vm389_vm0, %v2442_v35  ;;  %v3349_v25 = vpop.f32.mrb[36].mxu1 }
 0xb24   : > { %v2445_v38 = vadd.f32 %v3349_v25, %v2300_v46  ;;  %v2421_v39 = vpop.f32.mrb[37].mxu1 }
 0xb25   : > { %v2444_v50 = vadd.f32 %v2421_v39, %v2299_v52  ;;  %v2457_v2 = vld [vmem:[#allocation3 + $0x8] sm:$0xff] }
 0xb26   : > { %2453 = vst.msk [vmem:[#allocation3 + $0x28] sm:$0xff] %vm389_vm0, %v2445_v38  ;;  %v2456_v47 = vld [vmem:[#allocation3] sm:$0xff] }
 0xb27   : > { %2452 = vst.msk [vmem:[#allocation3 + $0x20] sm:$0xff] %vm389_vm0, %v2444_v50  ;;  %v3352_v51 = vpop.f32.mrb[38].mxu1  ;;  %3361 = vmatprep.mubr.msk.f32.mxu1 %vm389_vm0, %v2456_v47 }
 0xb28   : > { %v2447_v23 = vadd.f32 %v3352_v51, %v2302_v53  ;;  %v2431_v36 = vpop.f32.mrb[39].mxu1  ;;  %3362 = vmatmul.mubr.msk.f32.vlgmr.msra.gmra.mrb[40].mxu1 %vm389_vm0, %v2457_v2 }
 0xb29   : > { %v2446_v49 = vadd.f32 %v2431_v36, %v2301_v20  ;;  %v2459_v54 = vld [vmem:[#allocation3 + $0x18] sm:$0xff] }
 0xb2a   : > { %2455 = vst.msk [vmem:[#allocation3 + $0x38] sm:$0xff] %vm389_vm0, %v2447_v23  ;;  %v2458_v45 = vld [vmem:[#allocation3 + $0x10] sm:$0xff] }
 0xb2b   : > { %2454 = vst.msk [vmem:[#allocation3 + $0x30] sm:$0xff] %vm389_vm0, %v2446_v49  ;;  %3364 = vmatprep.mubr.msk.f32.mxu1 %vm389_vm0, %v2458_v45 }
 0xb2c   : > { %3365 = vmatmul.mubr.msk.f32.gmra.mrb[42].mxu1 %vm389_vm0, %v2459_v54 }
 0xb2d   : > { %v2461_v63 = vld [vmem:[#allocation3 + $0x28] sm:$0xff] }
 0xb2e   : > { %v2460_v55 = vld [vmem:[#allocation3 + $0x20] sm:$0xff] }
 0xb2f   : > { %3367 = vmatprep.mubr.msk.f32.mxu1 %vm389_vm0, %v2460_v55 }
 0xb30   : > { %3368 = vmatmul.mubr.msk.f32.gmra.mrb[44].mxu1 %vm389_vm0, %v2461_v63 }
 0xb31   : > { %v2463_v61 = vld [vmem:[#allocation3 + $0x38] sm:$0xff] }
 0xb32   : > { %v2462_v0 = vld [vmem:[#allocation3 + $0x30] sm:$0xff] }
 0xb33   : > { %3370 = vmatprep.mubr.msk.f32.mxu1 %vm389_vm0, %v2462_v0 }
 0xb34   : > { %3371 = vmatmul.mubr.msk.f32.gmra.mrb[46].mxu1 %vm389_vm0, %v2463_v61 }
 0xbfb   : > { %v3363_v10 = vpop.f32.mrb[40].mxu1 }
 0xbfc   : > { %v2571_v8 = vadd.f32 %v3363_v10, %v2880_v33  ;;  %v2565_v3 = vpop.f32.mrb[41].mxu1 }
 0xbfd   : > { %v2566_v48 = vadd.f32 %v2880_v33, %v2565_v3 }
 0xbfe   : > { %2605 = vst.msk [vmem:[%s367_s6 + $0x8] sm:$0xff] %vm389_vm0, %v2571_v8 }
 0xbff   : > { %2604 = vst.msk [vmem:[%s367_s6] sm:$0xff] %vm389_vm0, %v2566_v48  ;;  %v3366_v17 = vpop.f32.mrb[42].mxu1 }
 0xc00   : > { %v2581_v18 = vadd.f32 %v3366_v17, %v2880_v33  ;;  %v2575_v4 = vpop.f32.mrb[43].mxu1 }
 0xc01   : > { %v2576_v5 = vadd.f32 %v2880_v33, %v2575_v4 }
 0xc02   : > { %2607 = vst.msk [vmem:[%s367_s6 + $0x18] sm:$0xff] %vm389_vm0, %v2581_v18 }
 0xc03   : > { %2606 = vst.msk [vmem:[%s367_s6 + $0x10] sm:$0xff] %vm389_vm0, %v2576_v5  ;;  %v3369_v43 = vpop.f32.mrb[44].mxu1 }
 0xc04   : > { %v2591_v6 = vadd.f32 %v3369_v43, %v2880_v33  ;;  %v2585_v12 = vpop.f32.mrb[45].mxu1 }
 0xc05   : > { %v2586_v14 = vadd.f32 %v2880_v33, %v2585_v12 }
 0xc06   : > { %2609 = vst.msk [vmem:[%s367_s6 + $0x28] sm:$0xff] %vm389_vm0, %v2591_v6 }
 0xc07   : > { %2608 = vst.msk [vmem:[%s367_s6 + $0x20] sm:$0xff] %vm389_vm0, %v2586_v14  ;;  %v3372_v15 = vpop.f32.mrb[46].mxu1 }
 0xc08   : > { %v2601_v21 = vadd.f32 %v3372_v15, %v2880_v33  ;;  %v2595_v22 = vpop.f32.mrb[47].mxu1 }
 0xc09   : > { %v2596_v58 = vadd.f32 %v2880_v33, %v2595_v22 }
 0xc0a   : > { %2611 = vst.msk [vmem:[%s367_s6 + $0x38] sm:$0xff] %vm389_vm0, %v2601_v21 }
 0xc0b   : > { %2610 = vst.msk [vmem:[%s367_s6 + $0x30] sm:$0xff] %vm389_vm0, %v2596_v58 }
 0xc0c PF: > { %s4912_s27 = sld [smem:[#allocation14_spill]]  ;;  %s4913_s24 = smov %s3963_s25 }
 0xc0d   : > { %s4914_s25 = smov %s3967_s26  ;;  %s4915_s26 = smov %s4252_s19 }
 0xc0e   : > { %s4917_s28 = smov %s3983_s30  ;;  %s4919_s30 = smov %s4925_s7 }
 0xc12   : > { %s22_s8 = sadd.s32 1, %s4912_s27   ;;  %s4916_s27 = smov %s3979_s29 }
 0xc13   : > { %p19_p1 = scmp.ge.s32.totalorder %s22_s8, 10   ;;  %s4918_s29 = smov %s4921_s9 }
 0xc15   :  { %21 = sbr.rel (!%p19_p1) target bundleno = 11 (0xb), region = 112 }
 0xc1c   :  { %2639 = vsyncpa [#allocation5], 1 }
 0xc1d   :  { %2641 = vsyncpa [#allocation5 + $0x1], 1 }
 0xc1e   :  { %2642 = vsyncpa [#allocation7], 1 }
 0xc1f   :  { %2643 = vsyncpa [#allocation10], 1 }

</bundles_post_ra>
